<compile_context>
chip_gen: v7x
topology: tpu7x:2x2x1
jax: 0.10.0
libtpu: 0.0.40
codegen_flags: <defaults>
</compile_context>

<pallas_src>
import jax
import jax.numpy as jnp
from jax.experimental import pallas as pl
from jax.experimental.pallas import tpu as pltpu

# ---- module hyper-parameters (consistent with the PyTorch module) ----
CHANNELS = 1
IMG_SIZE = 16
N_CLASSES = 10
N_FEATURES = CHANNELS * IMG_SIZE * IMG_SIZE   # 256

G1, P1 = 240, 5     # x_map: Linear(n_features, 240*5) -> maxout over 5
G2, P2 = 50, 5      # y_map: Linear(n_classes, 50*5)   -> maxout over 5
G3, P3 = 240, 4     # j_map: Linear(240+50, 240*4)     -> maxout over 4

# Lane-padded group widths (multiples of 128; padding is exact, see pack_params)
G1P = 256
G2P = 128
G3P = 256

TILE_B = 256        # batch rows per grid step


def _discriminator_kernel(x_ref, y_ref,
                          w1_ref, b1_ref,
                          w2_ref, b2_ref,
                          w3x_ref, w3y_ref, b3_ref,
                          w4_ref, b4_ref,
                          out_ref):
    x = x_ref[...]                       # (TB, 256) bf16
    y = y_ref[...]                       # (TB, 10)  bf16

    # ---- x_map: one wide matmul, maxout over P1 lane-aligned 256-wide slabs ----
    h1_all = jnp.dot(x, w1_ref[...], preferred_element_type=jnp.float32) + b1_ref[...]
    h1 = h1_all[:, 0:G1P]
    for p in range(1, P1):
        h1 = jnp.maximum(h1, h1_all[:, p * G1P:(p + 1) * G1P])      # (TB, 256) f32

    # ---- y_map: one wide matmul, maxout over P2 128-wide slabs ----
    h2_all = jnp.dot(y, w2_ref[...], preferred_element_type=jnp.float32) + b2_ref[...]
    h2 = h2_all[:, 0:G2P]
    for p in range(1, P2):
        h2 = jnp.maximum(h2, h2_all[:, p * G2P:(p + 1) * G2P])      # (TB, 128) f32

    h1b = h1.astype(jnp.bfloat16)
    h2b = h2.astype(jnp.bfloat16)

    # ---- j_map on cat(h1, h2): split weights, maxout over P3 256-wide slabs ----
    h3_all = (jnp.dot(h1b, w3x_ref[...], preferred_element_type=jnp.float32)
              + jnp.dot(h2b, w3y_ref[...], preferred_element_type=jnp.float32)
              + b3_ref[...])
    h3 = h3_all[:, 0:G3P]
    for p in range(1, P3):
        h3 = jnp.maximum(h3, h3_all[:, p * G3P:(p + 1) * G3P])      # (TB, 256) f32

    # ---- final Linear(240, 1) + Sigmoid: VPU multiply + lane reduce ----
    logit = jnp.sum(h3 * w4_ref[...], axis=-1, keepdims=True) + b4_ref[...]
    out_ref[...] = jax.nn.sigmoid(logit).astype(out_ref.dtype)


def init_params(key):
    """Deterministic parameter init; PyTorch Linear convention W:(out,in), b:(out,)."""
    ks = jax.random.split(key, 8)

    def lin(kw, kb, out_f, in_f, scale):
        w = jax.random.normal(kw, (out_f, in_f), jnp.float32) * scale
        b = jax.random.normal(kb, (out_f,), jnp.float32) * scale
        return w, b

    w1, b1 = lin(ks[0], ks[1], G1 * P1, N_FEATURES, 0.05)   # x_map
    w2, b2 = lin(ks[2], ks[3], G2 * P2, N_CLASSES, 0.1)     # y_map
    w3, b3 = lin(ks[4], ks[5], G3 * P3, G1 + G2, 0.05)      # j_map
    w4, b4 = lin(ks[6], ks[7], 1, G1, 0.05)                 # model (Linear(240,1))
    return (w1, b1, w2, b2, w3, b3, w4, b4)


def _stack_pad(w, b, groups, pieces, gpad):
    """(out=groups*pieces, in), (out,) -> W:(in, pieces*gpad), b:(1, pieces*gpad).

    PyTorch `view(-1, G, P).max(dim=2)` maps output column g*P + p to
    (group g, piece p); slab p therefore takes columns p::pieces.  Groups are
    zero-padded to `gpad` lanes (zero weight columns + zero bias -> padded
    activation lanes are exactly 0 after the maxout).
    """
    wt = w.T                                                 # (in, out)
    slabs_w, slabs_b = [], []
    for p in range(pieces):
        wp = jnp.pad(wt[:, p::pieces], ((0, 0), (0, gpad - groups)))
        bp = jnp.pad(b[p::pieces], (0, gpad - groups))
        slabs_w.append(wp)
        slabs_b.append(bp)
    wm = jnp.concatenate(slabs_w, axis=1)                    # (in, pieces*gpad)
    bm = jnp.concatenate(slabs_b)[None, :]                   # (1, pieces*gpad)
    return wm, bm


def pack_params(params):
    """One-time weight re-packing (do NOT call per forward)."""
    w1, b1, w2, b2, w3, b3, w4, b4 = params

    w1m, b1m = _stack_pad(w1, b1, G1, P1, G1P)               # (256, 1280), (1, 1280)
    w2m, b2m = _stack_pad(w2, b2, G2, P2, G2P)               # (10, 640),   (1, 640)
    w3m, b3m = _stack_pad(w3, b3, G3, P3, G3P)               # (290, 1024), (1, 1024)

    # cat(h1, h2) @ W3 == h1 @ W3x + h2 @ W3y ; pad K-rows matching padded lanes.
    w3x = jnp.pad(w3m[:G1, :], ((0, G1P - G1), (0, 0)))      # (256, 1024)
    w3y = jnp.pad(w3m[G1:, :], ((0, G2P - G2), (0, 0)))      # (128, 1024)

    w4row = jnp.pad(w4.reshape(1, G1), ((0, 0), (0, G1P - G1)))   # (1, 256)
    b4r = b4.reshape(1, 1)

    return dict(
        w1=w1m.astype(jnp.bfloat16), b1=b1m.astype(jnp.float32),
        w2=w2m.astype(jnp.bfloat16), b2=b2m.astype(jnp.float32),
        w3x=w3x.astype(jnp.bfloat16), w3y=w3y.astype(jnp.bfloat16),
        b3=b3m.astype(jnp.float32),
        w4=w4row.astype(jnp.float32), b4=b4r.astype(jnp.float32),
    )


def _round_up(n, m):
    return ((n + m - 1) // m) * m


def discriminator_forward(x_nchw, y, packed, *, tile_b=TILE_B):
    B = x_nchw.shape[0]
    x = x_nchw.reshape(B, N_FEATURES).astype(jnp.bfloat16)   # x.view(-1, n_features)
    y2 = y.reshape(B, N_CLASSES).astype(jnp.bfloat16)

    # Cap the batch tile for tiny batches (block sublane dim must stay /8).
    tile_b = min(tile_b, _round_up(B, 8))

    # Pad batch to a tile multiple (padded rows are computed and sliced off).
    n_tiles = pl.cdiv(B, tile_b)
    bp = n_tiles * tile_b
    if bp != B:
        x = jnp.pad(x, ((0, bp - B), (0, 0)))
        y2 = jnp.pad(y2, ((0, bp - B), (0, 0)))

    batch = lambda shape: pl.BlockSpec(shape, lambda i: (i, 0))   # tiled on batch
    const = lambda shape: pl.BlockSpec(shape, lambda i: (0, 0))   # VMEM-resident weights

    out = pl.pallas_call(
        _discriminator_kernel,
        out_shape=jax.ShapeDtypeStruct((bp, 1), jnp.float32),
        grid=(n_tiles,),
        in_specs=[
            batch((tile_b, N_FEATURES)),      # x
            batch((tile_b, N_CLASSES)),       # y
            const((N_FEATURES, P1 * G1P)),    # w1
            const((1, P1 * G1P)),             # b1
            const((N_CLASSES, P2 * G2P)),     # w2
            const((1, P2 * G2P)),             # b2
            const((G1P, P3 * G3P)),           # w3x
            const((G2P, P3 * G3P)),           # w3y
            const((1, P3 * G3P)),             # b3
            const((1, G1P)),                  # w4 (row)
            const((1, 1)),                    # b4
        ],
        out_specs=batch((tile_b, 1)),
        compiler_params=pltpu.CompilerParams(
            dimension_semantics=("parallel",),      # megacore sharding on v7x
        ),
    )(x, y2, packed["w1"], packed["b1"], packed["w2"], packed["b2"],
      packed["w3x"], packed["w3y"], packed["b3"], packed["w4"], packed["b4"])

    return out[:B]


def _reference_forward(x_nchw, y, params):
    """Pure-JAX f32 reference mirroring the PyTorch forward."""
    w1, b1, w2, b2, w3, b3, w4, b4 = params
    B = x_nchw.shape[0]
    x = x_nchw.reshape(B, N_FEATURES)
    xm = (x @ w1.T + b1).reshape(B, G1, P1).max(axis=2)
    ym = (y.reshape(B, N_CLASSES) @ w2.T + b2).reshape(B, G2, P2).max(axis=2)
    j = jnp.concatenate([xm, ym], axis=1)
    jm = (j @ w3.T + b3).reshape(B, G3, P3).max(axis=2)
    return jax.nn.sigmoid(jm @ w4.T + b4)


if __name__ == "__main__":
    key = jax.random.PRNGKey(0)
    kx, ky, kp = jax.random.split(key, 3)

    B = 2
    x = jax.random.normal(kx, (B, CHANNELS, IMG_SIZE, IMG_SIZE), jnp.float32)  # NCHW
    y_onehot = jax.nn.one_hot(
        jax.random.randint(ky, (B,), 0, N_CLASSES), N_CLASSES, dtype=jnp.float32)

    params = init_params(kp)
    packed = pack_params(params)       # one-time packing (hoisted out of forward)

    out = discriminator_forward(x, y_onehot, packed)
    out = jax.block_until_ready(out)

    ref = _reference_forward(x, y_onehot, params)
    assert out.shape == (B, 1)
    # bf16 matmul operands with f32 accumulation -> small drift vs f32 reference.
    assert jnp.allclose(out, ref, atol=2e-2, rtol=2e-2), (out, ref)

    print("KERNEL_OK")
</pallas_src>

<mosaic_0001>
module attributes {stable_mosaic.version = 11 : i64} {
  func.func @_discriminator_kernel(%arg0: i32, %arg1: memref<8x256xbf16, #tpu.memory_space<vmem>>, %arg2: memref<8x10xbf16, #tpu.memory_space<vmem>>, %arg3: memref<256x1280xbf16, #tpu.memory_space<vmem>>, %arg4: memref<1x1280xf32, #tpu.memory_space<vmem>>, %arg5: memref<10x640xbf16, #tpu.memory_space<vmem>>, %arg6: memref<1x640xf32, #tpu.memory_space<vmem>>, %arg7: memref<256x1024xbf16, #tpu.memory_space<vmem>>, %arg8: memref<128x1024xbf16, #tpu.memory_space<vmem>>, %arg9: memref<1x1024xf32, #tpu.memory_space<vmem>>, %arg10: memref<1x256xf32, #tpu.memory_space<vmem>>, %arg11: memref<1x1xf32, #tpu.memory_space<vmem>>, %arg12: memref<8x1xf32, #tpu.memory_space<vmem>>) attributes {dimension_semantics = [#tpu.dimension_semantics<parallel>], iteration_bounds = array<i64: 1>, scalar_prefetch = 0 : i64, scratch_operands = 0 : i64, tpu.core_type = #tpu.core_type<tc>, window_params = [{transform_indices = @transform_0, window_bounds = array<i64: 8, 256>}, {transform_indices = @transform_1, window_bounds = array<i64: 8, 10>}, {pipeline_mode = #tpu.pipeline_mode<synchronous>, transform_indices = @transform_2, window_bounds = array<i64: 256, 1280>}, {pipeline_mode = #tpu.pipeline_mode<synchronous>, transform_indices = @transform_3, window_bounds = array<i64: 1, 1280>}, {pipeline_mode = #tpu.pipeline_mode<synchronous>, transform_indices = @transform_4, window_bounds = array<i64: 10, 640>}, {pipeline_mode = #tpu.pipeline_mode<synchronous>, transform_indices = @transform_5, window_bounds = array<i64: 1, 640>}, {pipeline_mode = #tpu.pipeline_mode<synchronous>, transform_indices = @transform_6, window_bounds = array<i64: 256, 1024>}, {pipeline_mode = #tpu.pipeline_mode<synchronous>, transform_indices = @transform_7, window_bounds = array<i64: 128, 1024>}, {pipeline_mode = #tpu.pipeline_mode<synchronous>, transform_indices = @transform_8, window_bounds = array<i64: 1, 1024>}, {pipeline_mode = #tpu.pipeline_mode<synchronous>, transform_indices = @transform_9, window_bounds = array<i64: 1, 256>}, {pipeline_mode = #tpu.pipeline_mode<synchronous>, transform_indices = @transform_10, window_bounds = array<i64: 1, 1>}, {transform_indices = @transform_11, window_bounds = array<i64: 8, 1>}]} {
    %c0 = arith.constant 0 : index
    %c0_0 = arith.constant 0 : index
    %0 = vector.load %arg1[%c0, %c0_0] : memref<8x256xbf16, #tpu.memory_space<vmem>>, vector<8x256xbf16>
    %c0_1 = arith.constant 0 : index
    %c0_2 = arith.constant 0 : index
    %1 = vector.load %arg2[%c0_1, %c0_2] : memref<8x10xbf16, #tpu.memory_space<vmem>>, vector<8x10xbf16>
    %c0_3 = arith.constant 0 : index
    %c0_4 = arith.constant 0 : index
    %2 = vector.load %arg3[%c0_3, %c0_4] : memref<256x1280xbf16, #tpu.memory_space<vmem>>, vector<256x1280xbf16>
    %cst = arith.constant dense<0.000000e+00> : vector<8x1280xf32>
    %3 = tpu.matmul %0, %2, %cst {dimension_numbers = #tpu.dot_dimension_numbers<[1], [0], [0], [1], [0, 0, 1, 1], [], []>} : vector<8x256xbf16>, vector<256x1280xbf16>, vector<8x1280xf32> -> vector<8x1280xf32>
    %c0_5 = arith.constant 0 : index
    %c0_6 = arith.constant 0 : index
    %4 = vector.load %arg4[%c0_5, %c0_6] : memref<1x1280xf32, #tpu.memory_space<vmem>>, vector<1x1280xf32>
    %5 = vector.broadcast %4 : vector<1x1280xf32> to vector<8x1280xf32>
    %6 = arith.addf %3, %5 : vector<8x1280xf32>
    %7 = vector.extract_strided_slice %6 {offsets = [0, 0], sizes = [8, 256], strides = [1, 1]} : vector<8x1280xf32> to vector<8x256xf32>
    %8 = vector.extract_strided_slice %6 {offsets = [0, 256], sizes = [8, 256], strides = [1, 1]} : vector<8x1280xf32> to vector<8x256xf32>
    %9 = arith.maximumf %7, %8 : vector<8x256xf32>
    %10 = vector.extract_strided_slice %6 {offsets = [0, 512], sizes = [8, 256], strides = [1, 1]} : vector<8x1280xf32> to vector<8x256xf32>
    %11 = arith.maximumf %9, %10 : vector<8x256xf32>
    %12 = vector.extract_strided_slice %6 {offsets = [0, 768], sizes = [8, 256], strides = [1, 1]} : vector<8x1280xf32> to vector<8x256xf32>
    %13 = arith.maximumf %11, %12 : vector<8x256xf32>
    %14 = vector.extract_strided_slice %6 {offsets = [0, 1024], sizes = [8, 256], strides = [1, 1]} : vector<8x1280xf32> to vector<8x256xf32>
    %15 = arith.maximumf %13, %14 : vector<8x256xf32>
    %c0_7 = arith.constant 0 : index
    %c0_8 = arith.constant 0 : index
    %16 = vector.load %arg5[%c0_7, %c0_8] : memref<10x640xbf16, #tpu.memory_space<vmem>>, vector<10x640xbf16>
    %cst_9 = arith.constant dense<0.000000e+00> : vector<8x640xf32>
    %17 = tpu.matmul %1, %16, %cst_9 {dimension_numbers = #tpu.dot_dimension_numbers<[1], [0], [0], [1], [0, 0, 1, 1], [], []>} : vector<8x10xbf16>, vector<10x640xbf16>, vector<8x640xf32> -> vector<8x640xf32>
    %c0_10 = arith.constant 0 : index
    %c0_11 = arith.constant 0 : index
    %18 = vector.load %arg6[%c0_10, %c0_11] : memref<1x640xf32, #tpu.memory_space<vmem>>, vector<1x640xf32>
    %19 = vector.broadcast %18 : vector<1x640xf32> to vector<8x640xf32>
    %20 = arith.addf %17, %19 : vector<8x640xf32>
    %21 = vector.extract_strided_slice %20 {offsets = [0, 0], sizes = [8, 128], strides = [1, 1]} : vector<8x640xf32> to vector<8x128xf32>
    %22 = vector.extract_strided_slice %20 {offsets = [0, 128], sizes = [8, 128], strides = [1, 1]} : vector<8x640xf32> to vector<8x128xf32>
    %23 = arith.maximumf %21, %22 : vector<8x128xf32>
    %24 = vector.extract_strided_slice %20 {offsets = [0, 256], sizes = [8, 128], strides = [1, 1]} : vector<8x640xf32> to vector<8x128xf32>
    %25 = arith.maximumf %23, %24 : vector<8x128xf32>
    %26 = vector.extract_strided_slice %20 {offsets = [0, 384], sizes = [8, 128], strides = [1, 1]} : vector<8x640xf32> to vector<8x128xf32>
    %27 = arith.maximumf %25, %26 : vector<8x128xf32>
    %28 = vector.extract_strided_slice %20 {offsets = [0, 512], sizes = [8, 128], strides = [1, 1]} : vector<8x640xf32> to vector<8x128xf32>
    %29 = arith.maximumf %27, %28 : vector<8x128xf32>
    %30 = arith.truncf %15 : vector<8x256xf32> to vector<8x256xbf16>
    %31 = arith.truncf %29 : vector<8x128xf32> to vector<8x128xbf16>
    %c0_12 = arith.constant 0 : index
    %c0_13 = arith.constant 0 : index
    %32 = vector.load %arg7[%c0_12, %c0_13] : memref<256x1024xbf16, #tpu.memory_space<vmem>>, vector<256x1024xbf16>
    %cst_14 = arith.constant dense<0.000000e+00> : vector<8x1024xf32>
    %33 = tpu.matmul %30, %32, %cst_14 {dimension_numbers = #tpu.dot_dimension_numbers<[1], [0], [0], [1], [0, 0, 1, 1], [], []>} : vector<8x256xbf16>, vector<256x1024xbf16>, vector<8x1024xf32> -> vector<8x1024xf32>
    %c0_15 = arith.constant 0 : index
    %c0_16 = arith.constant 0 : index
    %34 = vector.load %arg8[%c0_15, %c0_16] : memref<128x1024xbf16, #tpu.memory_space<vmem>>, vector<128x1024xbf16>
    %cst_17 = arith.constant dense<0.000000e+00> : vector<8x1024xf32>
    %35 = tpu.matmul %31, %34, %cst_17 {dimension_numbers = #tpu.dot_dimension_numbers<[1], [0], [0], [1], [0, 0, 1, 1], [], []>} : vector<8x128xbf16>, vector<128x1024xbf16>, vector<8x1024xf32> -> vector<8x1024xf32>
    %36 = arith.addf %33, %35 : vector<8x1024xf32>
    %c0_18 = arith.constant 0 : index
    %c0_19 = arith.constant 0 : index
    %37 = vector.load %arg9[%c0_18, %c0_19] : memref<1x1024xf32, #tpu.memory_space<vmem>>, vector<1x1024xf32>
    %38 = vector.broadcast %37 : vector<1x1024xf32> to vector<8x1024xf32>
    %39 = arith.addf %36, %38 : vector<8x1024xf32>
    %40 = vector.extract_strided_slice %39 {offsets = [0, 0], sizes = [8, 256], strides = [1, 1]} : vector<8x1024xf32> to vector<8x256xf32>
    %41 = vector.extract_strided_slice %39 {offsets = [0, 256], sizes = [8, 256], strides = [1, 1]} : vector<8x1024xf32> to vector<8x256xf32>
    %42 = arith.maximumf %40, %41 : vector<8x256xf32>
    %43 = vector.extract_strided_slice %39 {offsets = [0, 512], sizes = [8, 256], strides = [1, 1]} : vector<8x1024xf32> to vector<8x256xf32>
    %44 = arith.maximumf %42, %43 : vector<8x256xf32>
    %45 = vector.extract_strided_slice %39 {offsets = [0, 768], sizes = [8, 256], strides = [1, 1]} : vector<8x1024xf32> to vector<8x256xf32>
    %46 = arith.maximumf %44, %45 : vector<8x256xf32>
    %c0_20 = arith.constant 0 : index
    %c0_21 = arith.constant 0 : index
    %47 = vector.load %arg10[%c0_20, %c0_21] : memref<1x256xf32, #tpu.memory_space<vmem>>, vector<1x256xf32>
    %48 = vector.broadcast %47 : vector<1x256xf32> to vector<8x256xf32>
    %49 = arith.mulf %46, %48 : vector<8x256xf32>
    %cst_22 = arith.constant dense<0.000000e+00> : vector<8xf32>
    %50 = vector.multi_reduction <add>, %49, %cst_22 [1] : vector<8x256xf32> to vector<8xf32>
    %51 = vector.shape_cast %50 : vector<8xf32> to vector<8x1xf32>
    %c0_23 = arith.constant 0 : index
    %c0_24 = arith.constant 0 : index
    %52 = vector.load %arg11[%c0_23, %c0_24] : memref<1x1xf32, #tpu.memory_space<vmem>>, vector<1x1xf32>
    %53 = vector.broadcast %52 : vector<1x1xf32> to vector<8x1xf32>
    %54 = arith.addf %51, %53 : vector<8x1xf32>
    %55 = arith.negf %54 : vector<8x1xf32>
    %56 = math.exp %55 : vector<8x1xf32>
    %cst_25 = arith.constant 1.000000e+00 : f32
    %57 = vector.broadcast %cst_25 : f32 to vector<8x1xf32>
    %58 = arith.addf %57, %56 : vector<8x1xf32>
    %59 = arith.divf %57, %58 : vector<8x1xf32>
    %c0_26 = arith.constant 0 : index
    %c0_27 = arith.constant 0 : index
    %60 = vector.load %arg12[%c0_26, %c0_27] : memref<8x1xf32, #tpu.memory_space<vmem>>, vector<8x1xf32>
    tpu.vector_store %arg12[%c0_26, %c0_27], %59 {strides = array<i32>} : memref<8x1xf32, #tpu.memory_space<vmem>>, vector<8x1xf32>,
    return
  }
  func.func @transform_0(%arg0: i32) -> (i32, i32) {
    %c0_i32 = arith.constant 0 : i32
    %c0_i32_0 = arith.constant 0 : i32
    return %arg0, %c0_i32 : i32, i32
  }
  func.func @transform_1(%arg0: i32) -> (i32, i32) {
    %c0_i32 = arith.constant 0 : i32
    %c0_i32_0 = arith.constant 0 : i32
    return %arg0, %c0_i32 : i32, i32
  }
  func.func @transform_2(%arg0: i32) -> (i32, i32) {
    %c0_i32 = arith.constant 0 : i32
    %c0_i32_0 = arith.constant 0 : i32
    %c0_i32_1 = arith.constant 0 : i32
    return %c0_i32, %c0_i32_0 : i32, i32
  }
  func.func @transform_3(%arg0: i32) -> (i32, i32) {
    %c0_i32 = arith.constant 0 : i32
    %c0_i32_0 = arith.constant 0 : i32
    %c0_i32_1 = arith.constant 0 : i32
    return %c0_i32, %c0_i32_0 : i32, i32
  }
  func.func @transform_4(%arg0: i32) -> (i32, i32) {
    %c0_i32 = arith.constant 0 : i32
    %c0_i32_0 = arith.constant 0 : i32
    %c0_i32_1 = arith.constant 0 : i32
    return %c0_i32, %c0_i32_0 : i32, i32
  }
  func.func @transform_5(%arg0: i32) -> (i32, i32) {
    %c0_i32 = arith.constant 0 : i32
    %c0_i32_0 = arith.constant 0 : i32
    %c0_i32_1 = arith.constant 0 : i32
    return %c0_i32, %c0_i32_0 : i32, i32
  }
  func.func @transform_6(%arg0: i32) -> (i32, i32) {
    %c0_i32 = arith.constant 0 : i32
    %c0_i32_0 = arith.constant 0 : i32
    %c0_i32_1 = arith.constant 0 : i32
    return %c0_i32, %c0_i32_0 : i32, i32
  }
  func.func @transform_7(%arg0: i32) -> (i32, i32) {
    %c0_i32 = arith.constant 0 : i32
    %c0_i32_0 = arith.constant 0 : i32
    %c0_i32_1 = arith.constant 0 : i32
    return %c0_i32, %c0_i32_0 : i32, i32
  }
  func.func @transform_8(%arg0: i32) -> (i32, i32) {
    %c0_i32 = arith.constant 0 : i32
    %c0_i32_0 = arith.constant 0 : i32
    %c0_i32_1 = arith.constant 0 : i32
    return %c0_i32, %c0_i32_0 : i32, i32
  }
  func.func @transform_9(%arg0: i32) -> (i32, i32) {
    %c0_i32 = arith.constant 0 : i32
    %c0_i32_0 = arith.constant 0 : i32
    %c0_i32_1 = arith.constant 0 : i32
    return %c0_i32, %c0_i32_0 : i32, i32
  }
  func.func @transform_10(%arg0: i32) -> (i32, i32) {
    %c0_i32 = arith.constant 0 : i32
    %c0_i32_0 = arith.constant 0 : i32
    %c0_i32_1 = arith.constant 0 : i32
    return %c0_i32, %c0_i32_0 : i32, i32
  }
  func.func @transform_11(%arg0: i32) -> (i32, i32) {
    %c0_i32 = arith.constant 0 : i32
    %c0_i32_0 = arith.constant 0 : i32
    return %arg0, %c0_i32 : i32, i32
  }
}

</mosaic_0001>

<bundles_post_ra>
// kernel: tpu_custom_call.1
= control target key start
LH: loop header
LB: loop body
LE: loop exit
PB: predicated region body
PF: predicated region fallthrough
CT: control target
= control target key end

     0   :  { %s4298_s0 = inlined_call_operand.hbm [shape: bf16[8,256], index: 0, kind: input, shape index: {}]   ;;  %s4299_s1 = inlined_call_operand.hbm [shape: bf16[8,10], index: 1, kind: input, shape index: {}]   ;;  %s4300_s2 = inlined_call_operand.hbm [shape: bf16[256,1280], index: 2, kind: input, shape index: {}]   ;;  %s4301_s3 = inlined_call_operand.vmem [shape: f32[1,1280], index: 3, kind: input, shape index: {}]   ;;  %s4302_s4 = inlined_call_operand.hbm [shape: bf16[10,640], index: 4, kind: input, shape index: {}]   ;;  %s4303_s5 = inlined_call_operand.hbm [shape: f32[1,640], index: 5, kind: input, shape index: {}]   ;;  %s4304_s6 = inlined_call_operand.hbm [shape: bf16[256,1024], index: 6, kind: input, shape index: {}]   ;;  %s4305_s7 = inlined_call_operand.hbm [shape: bf16[128,1024], index: 7, kind: input, shape index: {}]   ;;  %s4306_s8 = inlined_call_operand.vmem [shape: f32[1,1024], index: 8, kind: input, shape index: {}]   ;;  %s4307_s9 = inlined_call_operand.vmem [shape: f32[1,256], index: 9, kind: input, shape index: {}]   ;;  %s4308_s10 = inlined_call_operand.<no memory space> [shape: f32[1,1], index: 10, kind: input, shape index: {}]   ;;  %s4309_s11 = inlined_call_operand.vmem [shape: f32[8,1], index: 11, kind: output, shape index: {}]  }
   0x1   :  { %v16_v0 = vstv %s4308_s10 }
   0x2   :  { %17 = vst [vmem:[#allocation2] sm:$0x1] %v16_v0 }
   0x3   :  { %18 = vsyncpa [#allocation4], 0 }
   0x4   :  { %19 = vsyncpa [#allocation6], 0 }
   0x5   :  { %20 = vsyncpa [#allocation9], 0 }
   0x6   :  { %21 = vsyncpa [#allocation12], 0  ;;  %s3951_s19 = smov [#allocation5]   ;;  %s3952_s21 = smov [#allocation8]  }
   0x7   :  { %s38_s20 = sshll.u32 %s3951_s19, 4  ;;  %s61_s22 = sshll.u32 %s3952_s21, 4  ;;  %s39_s20 = int_to_ptr.vmem [resolvable:$true] %s38_s20  ;;  %s4030_s22 = int_to_ptr.vmem [resolvable:$true] %s61_s22 }
   0x8   :  { %s3789_s25 = scalar_lea.hbm %s4299_s1, 64 }
   0x9   :  { %p3790_p0 = scmp.ne.s32.totalorder %s4299_s1, %s3789_s25  ;;  %p3793_p1 = scmp.lt.u32.totalorder %s3789_s25, %s4299_s1 }
   0xb   :  { %p3795_p2 = pnand %p3793_p1, %p3790_p0 }
   0xd   :  { %3798 = shalt.err (!%p3795_p2)
}
   0xe   :  { %s3799_s29 = scalar_lea.vmem %s39_s20, 64  ;;  %p3804_p4 = scmp.lt.s32.totalorder %s39_s20, %s39_s20 }
   0xf   :  { %p3800_p3 = scmp.ne.s32.totalorder %s39_s20, %s3799_s29  ;;  %p3805_p5 = scmp.lt.s32.totalorder %s3799_s29, %s3799_s29 }
  0x11   :  { %p3806_p6 = por %p3805_p5, %p3804_p4 }
  0x13   :  { %p3807_p7 = pnand %p3806_p6, %p3800_p3 }
  0x15   :  { %3810 = shalt.err (!%p3807_p7)
}
  0x16   :  { %41 = dma.hbm_to_vmem [thread:$0]  %s4299_s1, 64, %s39_s20, [#allocation6]  }
  0x17   :  { %s3811_s15 = scalar_lea.hbm %s4302_s4, 640 }
  0x18   :  { %p3812_p8 = scmp.ne.s32.totalorder %s4302_s4, %s3811_s15  ;;  %p3815_p9 = scmp.lt.u32.totalorder %s3811_s15, %s4302_s4 }
  0x1a   :  { %p3817_p10 = pnand %p3815_p9, %p3812_p8 }
  0x1c   :  { %3820 = shalt.err (!%p3817_p10)
}
  0x1d   :  { %s3821_s21 = scalar_lea.vmem %s4030_s22, 640  ;;  %p3826_p12 = scmp.lt.s32.totalorder %s4030_s22, %s4030_s22 }
  0x1e   :  { %p3822_p11 = scmp.ne.s32.totalorder %s4030_s22, %s3821_s21  ;;  %p3827_p13 = scmp.lt.s32.totalorder %s3821_s21, %s3821_s21 }
  0x20   :  { %p3828_p0 = por %p3827_p13, %p3826_p12 }
  0x22   :  { %p3829_p1 = pnand %p3828_p0, %p3822_p11 }
  0x24   :  { %3832 = shalt.err (!%p3829_p1)
}
  0x25   :  { %s3953_s1 = smov 320   ;;  %s3954_s20 = smov 20  }
  0x26   :  { %67 = dma.hbm_to_vmem [thread:$0]  %s4302_s4, 640, %s4030_s22, [#allocation9], %s3953_s1, %s3953_s1, %s3954_s20  }
  0x27   :  { %s3955_s25 = smov [#allocation11]   ;;  %s3833_s28 = scalar_lea.hbm %s4304_s6, 16384 }
  0x28   :  { %s83_s26 = sshll.u32 %s3955_s25, 4  ;;  %p3834_p2 = scmp.ne.s32.totalorder %s4304_s6, %s3833_s28  ;;  %s84_s26 = int_to_ptr.vmem [resolvable:$true] %s83_s26 }
  0x29   :  { %p3837_p3 = scmp.lt.u32.totalorder %s3833_s28, %s4304_s6 }
  0x2b   :  { %p3839_p4 = pnand %p3837_p3, %p3834_p2 }
  0x2d   :  { %3842 = shalt.err (!%p3839_p4)
}
  0x2e   :  { %s3843_s14 = scalar_lea.vmem %s84_s26, 16384  ;;  %p3848_p6 = scmp.lt.s32.totalorder %s84_s26, %s84_s26 }
  0x2f   :  { %p3844_p5 = scmp.ne.s32.totalorder %s84_s26, %s3843_s14  ;;  %p3849_p7 = scmp.lt.s32.totalorder %s3843_s14, %s3843_s14 }
  0x31   :  { %p3850_p8 = por %p3849_p7, %p3848_p6 }
  0x33   :  { %p3851_p9 = pnand %p3850_p8, %p3844_p5 }
  0x35   :  { %3854 = shalt.err (!%p3851_p9)
}
  0x36   :  { %s3956_s4 = smov 512   ;;  %s3957_s22 = smov 32  }
  0x37   :  { %89 = dma.hbm_to_vmem [thread:$0]  %s4304_s6, 16384, %s84_s26, [#allocation12], %s3956_s4, %s3956_s4, %s3957_s22  }
  0x38   :  { %s3958_s17 = smov [#allocation3]   ;;  %s3959_s19 = smov [#allocation7]  }
  0x39   :  { %s28_s18 = sshll.u32 %s3958_s17, 4  ;;  %s47_s21 = sshll.u32 %s3959_s19, 4  ;;  %s29_s18 = int_to_ptr.vmem [resolvable:$true] %s28_s18  ;;  %s48_s21 = int_to_ptr.vmem [resolvable:$true] %s47_s21 }
  0x3a   :  { %s3855_s23 = scalar_lea.hbm %s4298_s0, 128 }
  0x3b   :  { %p3856_p10 = scmp.ne.s32.totalorder %s4298_s0, %s3855_s23  ;;  %p3859_p11 = scmp.lt.u32.totalorder %s3855_s23, %s4298_s0 }
  0x3d   :  { %p3861_p12 = pnand %p3859_p11, %p3856_p10 }
  0x3f   :  { %3864 = shalt.err (!%p3861_p12)
}
  0x40   :  { %s3865_s6 = scalar_lea.vmem %s29_s18, 128  ;;  %p3870_p0 = scmp.lt.s32.totalorder %s29_s18, %s29_s18 }
  0x41   :  { %p3866_p13 = scmp.ne.s32.totalorder %s29_s18, %s3865_s6  ;;  %p3871_p1 = scmp.lt.s32.totalorder %s3865_s6, %s3865_s6 }
  0x43   :  { %p3872_p2 = por %p3871_p1, %p3870_p0 }
  0x45   :  { %p3873_p3 = pnand %p3872_p2, %p3866_p13 }
  0x47   :  { %3876 = shalt.err (!%p3873_p3)
}
  0x48   :  { %31 = dma.hbm_to_vmem [thread:$0]  %s4298_s0, 128, %s29_s18, [#allocation4]  }
  0x49   :  { %s3877_s12 = scalar_lea.hbm %s4300_s2, 20480 }
  0x4a   :  { %p3878_p4 = scmp.ne.s32.totalorder %s4300_s2, %s3877_s12  ;;  %p3881_p5 = scmp.lt.u32.totalorder %s3877_s12, %s4300_s2 }
  0x4c   :  { %p3883_p6 = pnand %p3881_p5, %p3878_p4 }
  0x4e   :  { %3886 = shalt.err (!%p3883_p6)
}
  0x4f   :  { %s3887_s17 = scalar_lea.vmem %s48_s21, 20480  ;;  %p3892_p8 = scmp.lt.s32.totalorder %s48_s21, %s48_s21 }
  0x50   :  { %p3888_p7 = scmp.ne.s32.totalorder %s48_s21, %s3887_s17  ;;  %p3893_p9 = scmp.lt.s32.totalorder %s3887_s17, %s3887_s17 }
  0x52   :  { %p3894_p10 = por %p3893_p9, %p3892_p8 }
  0x54   :  { %p3895_p11 = pnand %p3894_p10, %p3888_p7 }
  0x56   :  { %3898 = shalt.err (!%p3895_p11)
}
  0x57   :  { %s3960_s0 = smov 640   ;;  %s3961_s18 = smov 40  }
  0x58   :  { %53 = dma.hbm_to_vmem [thread:$0]  %s4300_s2, 20480, %s48_s21, [#allocation6], %s3960_s0, %s3960_s0, %s3961_s18  }
  0x59   :  { %s3962_s20 = smov [#allocation10]   ;;  %s3963_s24 = smov [#allocation13]  }
  0x5a   :  { %s74_s23 = sshll.u32 %s3962_s20, 4  ;;  %s95_s25 = sshll.u32 %s3963_s24, 4  ;;  %s75_s23 = int_to_ptr.vmem [resolvable:$true] %s74_s23  ;;  %s96_s25 = int_to_ptr.vmem [resolvable:$true] %s95_s25 }
  0x5b   :  { %s3899_s6 = scalar_lea.hbm %s4303_s5, 80 }
  0x5c   :  { %p3900_p12 = scmp.ne.s32.totalorder %s4303_s5, %s3899_s6  ;;  %p3903_p13 = scmp.lt.u32.totalorder %s3899_s6, %s4303_s5 }
  0x5e   :  { %p3905_p0 = pnand %p3903_p13, %p3900_p12 }
  0x60   :  { %3908 = shalt.err (!%p3905_p0)
}
  0x61   :  { %s3909_s2 = scalar_lea.vmem %s75_s23, 80  ;;  %s3913_s21 = scalar_lea.vmem %s75_s23, 96 }
  0x62   :  { %p3910_p1 = scmp.ne.s32.totalorder %s75_s23, %s3909_s2  ;;  %p3914_p2 = scmp.lt.s32.totalorder %s75_s23, %s75_s23 }
  0x63   :  { %p3915_p3 = scmp.lt.s32.totalorder %s3913_s21, %s3909_s2 }
  0x65   :  { %p3916_p4 = por %p3915_p3, %p3914_p2 }
  0x67   :  { %p3917_p5 = pnand %p3916_p4, %p3910_p1 }
  0x69   :  { %3920 = shalt.err (!%p3917_p5)
}
  0x6a   :  { %77 = dma.hbm_to_vmem [thread:$0]  %s4303_s5, 80, %s75_s23, [#allocation9]  }
  0x6b   :  { %s3921_s16 = scalar_lea.hbm %s4305_s7, 8192 }
  0x6c   :  { %p3922_p6 = scmp.ne.s32.totalorder %s4305_s7, %s3921_s16  ;;  %p3925_p7 = scmp.lt.u32.totalorder %s3921_s16, %s4305_s7 }
  0x6e   :  { %p3927_p8 = pnand %p3925_p7, %p3922_p6 }
  0x70   :  { %3930 = shalt.err (!%p3927_p8)
}
  0x71   :  { %s3931_s1 = scalar_lea.vmem %s96_s25, 8192  ;;  %p3936_p10 = scmp.lt.s32.totalorder %s96_s25, %s96_s25 }
  0x72   :  { %p3932_p9 = scmp.ne.s32.totalorder %s96_s25, %s3931_s1  ;;  %p3937_p11 = scmp.lt.s32.totalorder %s3931_s1, %s3931_s1 }
  0x74   :  { %p3938_p12 = por %p3937_p11, %p3936_p10 }
  0x76   :  { %p3939_p13 = pnand %p3938_p12, %p3932_p9 }
  0x78   :  { %3942 = shalt.err (!%p3939_p13)
}
  0x79   :  { %101 = dma.hbm_to_vmem [thread:$0]  %s4305_s7, 8192, %s96_s25, [#allocation12], %s3956_s4, %s3956_s4, %s3957_s22  }
  0x7a   :  { %3943 = dma.done.wait [#allocation4], 128  }
  0x7b   :  { %3944 = vsyncadd [#allocation4], 4294967168 }
  0x7c   :  { %3945 = dma.done.wait [#allocation6], 20544  }
  0x7d   :  { %3946 = vsyncadd [#allocation6], 4294946752 }
  0x7e   :  { %3947 = dma.done.wait [#allocation9], 720  }
  0x7f   :  { %3948 = vsyncadd [#allocation9], 4294966576 }
  0x80   :  { %3949 = dma.done.wait [#allocation12], 24576  }
  0x81   :  { %3950 = vsyncadd [#allocation12], 4294942720  ;;  %v3536_v1 = vld [vmem:[#allocation7 + $0x4] ss:$40 sps:$4 sm:$0xff]   ;;  %v3540_v3 = vld [vmem:[#allocation7] ss:$40 sps:$4 sm:$0xff]  }
  0x82   :  { %v3538_v2 = vld [vmem:[#allocation7 + $0xc] ss:$40 sps:$4 sm:$0xff]   ;;  %1153 = vmatprep.subr.bf16.mxu0 %v3536_v1  ;;  %v3541_v4 = vld [vmem:[#allocation7 + $0x8] ss:$40 sps:$4 sm:$0xff]   ;;  %v3544_v6 = vld [vmem:[#allocation7 + $0x5c] ss:$40 sps:$4 sm:$0xff]  }
  0x83   :  { %1194 = vmatprep.subr.bf16.mxu1 %v3538_v2  ;;  %v3542_v5 = vld [vmem:[#allocation7 + $0x54] ss:$40 sps:$4 sm:$0xff]   ;;  %1154 = vmatpush1.bf16.msra.mxu0 %v3540_v3  ;;  %v3546_v7 = vld [vmem:[#allocation7 + $0x50] ss:$40 sps:$4 sm:$0xff]   ;;  %v3548_v9 = vld [vmem:[#allocation7 + $0xa4] ss:$40 sps:$4 sm:$0xff]  }
  0x84   :  { %1195 = vmatpush1.bf16.msra.mxu1 %v3541_v4  ;;  %1155 = vmatprep.subr.bf16.mxu0 %v3542_v5  ;;  %v3547_v8 = vld [vmem:[#allocation7 + $0x58] ss:$40 sps:$4 sm:$0xff]   ;;  %v3550_v10 = vld [vmem:[#allocation7 + $0xac] ss:$40 sps:$4 sm:$0xff]   ;;  %v3553_v12 = vld [vmem:[#allocation7 + $0xa8] ss:$40 sps:$4 sm:$0xff]  }
  0x85   :  { %1196 = vmatprep.subr.bf16.mxu1 %v3544_v6  ;;  %v3552_v11 = vld [vmem:[#allocation7 + $0xa0] ss:$40 sps:$4 sm:$0xff]   ;;  %v3554_v13 = vld [vmem:[#allocation7 + $0xf4] ss:$40 sps:$4 sm:$0xff]   ;;  %v3558_v15 = vld [vmem:[#allocation7 + $0xf0] ss:$40 sps:$4 sm:$0xff]  }
  0x86   :  { %v3556_v14 = vld [vmem:[#allocation7 + $0xfc] ss:$40 sps:$4 sm:$0xff]   ;;  %v3559_v16 = vld [vmem:[#allocation7 + $0xf8] ss:$40 sps:$4 sm:$0xff]   ;;  %v3562_v18 = vld [vmem:[#allocation7 + $0x14c] ss:$40 sps:$4 sm:$0xff]  }
  0x87   :  { %1156 = vmatpush1.bf16.msra.mxu0 %v3546_v7  ;;  %v3560_v17 = vld [vmem:[#allocation7 + $0x144] ss:$40 sps:$4 sm:$0xff]   ;;  %v3564_v19 = vld [vmem:[#allocation7 + $0x140] ss:$40 sps:$4 sm:$0xff]   ;;  %v3566_v21 = vld [vmem:[#allocation7 + $0x194] ss:$40 sps:$4 sm:$0xff]  }
  0x88   :  { %1197 = vmatpush1.bf16.msra.mxu1 %v3547_v8  ;;  %1157 = vmatprep.subr.bf16.mxu0 %v3548_v9  ;;  %v3565_v20 = vld [vmem:[#allocation7 + $0x148] ss:$40 sps:$4 sm:$0xff]   ;;  %v3568_v22 = vld [vmem:[#allocation7 + $0x19c] ss:$40 sps:$4 sm:$0xff]   ;;  %v3571_v24 = vld [vmem:[#allocation7 + $0x198] ss:$40 sps:$4 sm:$0xff]  }
  0x89   :  { %1198 = vmatprep.subr.bf16.mxu1 %v3550_v10  ;;  %v3570_v23 = vld [vmem:[#allocation7 + $0x190] ss:$40 sps:$4 sm:$0xff]   ;;  %v3572_v25 = vld [vmem:[#allocation7 + $0x1e4] ss:$40 sps:$4 sm:$0xff]   ;;  %v3576_v27 = vld [vmem:[#allocation7 + $0x1e0] ss:$40 sps:$4 sm:$0xff]  }
  0x8a   :  { %v3574_v26 = vld [vmem:[#allocation7 + $0x1ec] ss:$40 sps:$4 sm:$0xff]   ;;  %v3577_v28 = vld [vmem:[#allocation7 + $0x1e8] ss:$40 sps:$4 sm:$0xff]   ;;  %v3580_v30 = vld [vmem:[#allocation7 + $0x23c] ss:$40 sps:$4 sm:$0xff]  }
  0x8b   :  { %1158 = vmatpush1.bf16.msra.mxu0 %v3552_v11  ;;  %v3578_v29 = vld [vmem:[#allocation7 + $0x234] ss:$40 sps:$4 sm:$0xff]   ;;  %v3582_v31 = vld [vmem:[#allocation7 + $0x230] ss:$40 sps:$4 sm:$0xff]   ;;  %v3584_v33 = vld [vmem:[#allocation7 + $0x284] ss:$40 sps:$4 sm:$0xff]  }
  0x8c   :  { %1199 = vmatpush1.bf16.msra.mxu1 %v3553_v12  ;;  %1159 = vmatprep.subr.bf16.mxu0 %v3554_v13  ;;  %v3583_v32 = vld [vmem:[#allocation7 + $0x238] ss:$40 sps:$4 sm:$0xff]   ;;  %v3586_v34 = vld [vmem:[#allocation7 + $0x28c] ss:$40 sps:$4 sm:$0xff]   ;;  %v3589_v36 = vld [vmem:[#allocation7 + $0x288] ss:$40 sps:$4 sm:$0xff]  }
  0x8d   :  { %1200 = vmatprep.subr.bf16.mxu1 %v3556_v14  ;;  %v3588_v35 = vld [vmem:[#allocation7 + $0x280] ss:$40 sps:$4 sm:$0xff]   ;;  %v3590_v37 = vld [vmem:[#allocation7 + $0x2d4] ss:$40 sps:$4 sm:$0xff]   ;;  %v3594_v39 = vld [vmem:[#allocation7 + $0x2d0] ss:$40 sps:$4 sm:$0xff]  }
  0x8e   :  { %v3592_v38 = vld [vmem:[#allocation7 + $0x2dc] ss:$40 sps:$4 sm:$0xff]   ;;  %v3595_v40 = vld [vmem:[#allocation7 + $0x2d8] ss:$40 sps:$4 sm:$0xff]   ;;  %v3598_v42 = vld [vmem:[#allocation7 + $0x32c] ss:$40 sps:$4 sm:$0xff]  }
  0x8f   :  { %1160 = vmatpush1.bf16.msra.mxu0 %v3558_v15  ;;  %v3596_v41 = vld [vmem:[#allocation7 + $0x324] ss:$40 sps:$4 sm:$0xff]   ;;  %v3600_v43 = vld [vmem:[#allocation7 + $0x320] ss:$40 sps:$4 sm:$0xff]   ;;  %v3602_v45 = vld [vmem:[#allocation7 + $0x374] ss:$40 sps:$4 sm:$0xff]  }
  0x90   :  { %1201 = vmatpush1.bf16.msra.mxu1 %v3559_v16  ;;  %1161 = vmatprep.subr.bf16.mxu0 %v3560_v17  ;;  %v3601_v44 = vld [vmem:[#allocation7 + $0x328] ss:$40 sps:$4 sm:$0xff]   ;;  %v3604_v46 = vld [vmem:[#allocation7 + $0x37c] ss:$40 sps:$4 sm:$0xff]   ;;  %v130_v47 = vld [vmem:[#allocation3] sm:$0xff]  ;;  %vm1424_vm0 = vcmask 1044480  }
  0x91   :  { %1202 = vmatprep.subr.bf16.mxu1 %v3562_v18  ;;  %v3606_v48 = vld [vmem:[#allocation7 + $0x370] ss:$40 sps:$4 sm:$0xff]   ;;  %v4127_v49 = vcombine.high %v130_v47, %v130_v47  ;;  %v3608_v51 = vld [vmem:[#allocation7 + $0x3c4] ss:$40 sps:$4 sm:$0xff]   ;;  %v3612_v53 = vld [vmem:[#allocation7 + $0x3c0] ss:$40 sps:$4 sm:$0xff]   ;;  %v4131_v5 = vcombine.low %v130_v47, %v130_v47 }
  0x92   :  { %v3607_v50 = vld [vmem:[#allocation7 + $0x378] ss:$40 sps:$4 sm:$0xff]   ;;  %v3610_v52 = vld [vmem:[#allocation7 + $0x3cc] ss:$40 sps:$4 sm:$0xff]   ;;  %v3613_v54 = vld [vmem:[#allocation7 + $0x3c8] ss:$40 sps:$4 sm:$0xff]  }
  0x93   :  { %1162 = vmatpush1.bf16.msra.mxu0 %v3564_v19  ;;  %1185 = vmatprep.mubr.bf16.mxu0 %v4127_v49  ;;  %v3614_v55 = vld [vmem:[#allocation7 + $0x414] ss:$40 sps:$4 sm:$0xff]   ;;  %v3618_v57 = vld [vmem:[#allocation7 + $0x410] ss:$40 sps:$4 sm:$0xff]   ;;  %v3620_v59 = vld [vmem:[#allocation7 + $0x464] ss:$40 sps:$4 sm:$0xff]  }
  0x94   :  { %1203 = vmatpush1.bf16.msra.mxu1 %v3565_v20  ;;  %1163 = vmatprep.subr.bf16.mxu0 %v3566_v21  ;;  %v3616_v56 = vld [vmem:[#allocation7 + $0x41c] ss:$40 sps:$4 sm:$0xff]   ;;  %v3619_v58 = vld [vmem:[#allocation7 + $0x418] ss:$40 sps:$4 sm:$0xff]   ;;  %v3622_v60 = vld [vmem:[#allocation7 + $0x46c] ss:$40 sps:$4 sm:$0xff]  }
  0x95   :  { %1204 = vmatprep.subr.bf16.mxu1 %v3568_v22  ;;  %1226 = vmatprep.mubr.bf16.mxu1 %v4127_v49  ;;  %v3624_v61 = vld [vmem:[#allocation7 + $0x460] ss:$40 sps:$4 sm:$0xff]   ;;  %v3626_v63 = vld [vmem:[#allocation7 + $0x4b4] ss:$40 sps:$4 sm:$0xff]   ;;  %v3630_v1 = vld [vmem:[#allocation7 + $0x4b0] ss:$40 sps:$4 sm:$0xff]  }
  0x96   :  { %v3625_v62 = vld [vmem:[#allocation7 + $0x468] ss:$40 sps:$4 sm:$0xff]   ;;  %v3628_v0 = vld [vmem:[#allocation7 + $0x4bc] ss:$40 sps:$4 sm:$0xff]   ;;  %v3631_v2 = vld [vmem:[#allocation7 + $0x4b8] ss:$40 sps:$4 sm:$0xff]  }
  0x97   :  { %1164 = vmatpush1.bf16.msra.mxu0 %v3570_v23  ;;  %v3636_v3 = vld [vmem:[#allocation7 + $0x14] ss:$40 sps:$4 sm:$0xff]   ;;  %v3634_v6 = vld [vmem:[#allocation7 + $0x10] ss:$40 sps:$4 sm:$0xff]   ;;  %v3642_v8 = vld [vmem:[#allocation7 + $0x64] ss:$40 sps:$4 sm:$0xff]  }
  0x98   :  { %1205 = vmatpush1.bf16.msra.mxu1 %v3571_v24  ;;  %1165 = vmatprep.subr.bf16.mxu0 %v3572_v25  ;;  %v3639_v4 = vld [vmem:[#allocation7 + $0x1c] ss:$40 sps:$4 sm:$0xff]   ;;  %v3637_v7 = vld [vmem:[#allocation7 + $0x18] ss:$40 sps:$4 sm:$0xff]   ;;  %v3645_v9 = vld [vmem:[#allocation7 + $0x6c] ss:$40 sps:$4 sm:$0xff]  }
  0x99   :  { %1206 = vmatprep.subr.bf16.mxu1 %v3574_v26  ;;  %v3640_v10 = vld [vmem:[#allocation7 + $0x60] ss:$40 sps:$4 sm:$0xff]   ;;  %v3648_v12 = vld [vmem:[#allocation7 + $0xb4] ss:$40 sps:$4 sm:$0xff]   ;;  %v3646_v14 = vld [vmem:[#allocation7 + $0xb0] ss:$40 sps:$4 sm:$0xff]  }
  0x9a   :  { %v3643_v11 = vld [vmem:[#allocation7 + $0x68] ss:$40 sps:$4 sm:$0xff]   ;;  %v3651_v13 = vld [vmem:[#allocation7 + $0xbc] ss:$40 sps:$4 sm:$0xff]   ;;  %v3649_v15 = vld [vmem:[#allocation7 + $0xb8] ss:$40 sps:$4 sm:$0xff]  }
  0x9b   :  { %1166 = vmatpush1.bf16.msra.mxu0 %v3576_v27  ;;  %v3654_v16 = vld [vmem:[#allocation7 + $0x104] ss:$40 sps:$4 sm:$0xff]   ;;  %v3652_v18 = vld [vmem:[#allocation7 + $0x100] ss:$40 sps:$4 sm:$0xff]   ;;  %v3660_v20 = vld [vmem:[#allocation7 + $0x154] ss:$40 sps:$4 sm:$0xff]  }
  0x9c   :  { %1207 = vmatpush1.bf16.msra.mxu1 %v3577_v28  ;;  %1167 = vmatprep.subr.bf16.mxu0 %v3578_v29  ;;  %v3657_v17 = vld [vmem:[#allocation7 + $0x10c] ss:$40 sps:$4 sm:$0xff]   ;;  %v3655_v19 = vld [vmem:[#allocation7 + $0x108] ss:$40 sps:$4 sm:$0xff]   ;;  %v3663_v21 = vld [vmem:[#allocation7 + $0x15c] ss:$40 sps:$4 sm:$0xff]  }
  0x9d   :  { %1208 = vmatprep.subr.bf16.mxu1 %v3580_v30  ;;  %v3658_v22 = vld [vmem:[#allocation7 + $0x150] ss:$40 sps:$4 sm:$0xff]   ;;  %v3666_v24 = vld [vmem:[#allocation7 + $0x1a4] ss:$40 sps:$4 sm:$0xff]   ;;  %v3664_v26 = vld [vmem:[#allocation7 + $0x1a0] ss:$40 sps:$4 sm:$0xff]  }
  0x9e   :  { %v3661_v23 = vld [vmem:[#allocation7 + $0x158] ss:$40 sps:$4 sm:$0xff]   ;;  %v3669_v25 = vld [vmem:[#allocation7 + $0x1ac] ss:$40 sps:$4 sm:$0xff]   ;;  %v3667_v27 = vld [vmem:[#allocation7 + $0x1a8] ss:$40 sps:$4 sm:$0xff]  }
  0x9f   :  { %1168 = vmatpush1.bf16.msra.mxu0 %v3582_v31  ;;  %v3672_v28 = vld [vmem:[#allocation7 + $0x1f4] ss:$40 sps:$4 sm:$0xff]   ;;  %v3670_v30 = vld [vmem:[#allocation7 + $0x1f0] ss:$40 sps:$4 sm:$0xff]   ;;  %vm1420_vm1 = vcmask 80896   ;;  %vm3966_vm2 = vmmov 0  }
  0xa0   :  { %1209 = vmatpush1.bf16.msra.mxu1 %v3583_v32  ;;  %1169 = vmatprep.subr.bf16.mxu0 %v3584_v33  ;;  %v3675_v29 = vld [vmem:[#allocation7 + $0x1fc] ss:$40 sps:$4 sm:$0xff]   ;;  %v3673_v31 = vld [vmem:[#allocation7 + $0x1f8] ss:$40 sps:$4 sm:$0xff]   ;;  %v3681_v33 = vld [vmem:[#allocation7 + $0x24c] ss:$40 sps:$4 sm:$0xff]  }
  0xa1   :  { %1210 = vmatprep.subr.bf16.mxu1 %v3586_v34  ;;  %v3678_v32 = vld [vmem:[#allocation7 + $0x244] ss:$40 sps:$4 sm:$0xff]   ;;  %v3676_v34 = vld [vmem:[#allocation7 + $0x240] ss:$40 sps:$4 sm:$0xff]   ;;  %vm3136_vm3 = vcmask 7168  }
  0xa2   :  { %v3697_v47 = vld [vmem:[#allocation7 + $0x338] ss:$40 sps:$4 sm:$0xff]  }
  0xa3   :  { %1170 = vmatpush1.bf16.msra.mxu0 %v3588_v35  ;;  %v3679_v35 = vld [vmem:[#allocation7 + $0x248] ss:$40 sps:$4 sm:$0xff]  }
  0xa4   :  { %1211 = vmatpush1.bf16.msra.mxu1 %v3589_v36  ;;  %1171 = vmatprep.subr.bf16.mxu0 %v3590_v37  ;;  %v3684_v36 = vld [vmem:[#allocation7 + $0x294] ss:$40 sps:$4 sm:$0xff]  }
  0xa5   :  { %1212 = vmatprep.subr.bf16.mxu1 %v3592_v38  ;;  %v3687_v37 = vld [vmem:[#allocation7 + $0x29c] ss:$40 sps:$4 sm:$0xff]   ;;  %v3682_v38 = vld [vmem:[#allocation7 + $0x290] ss:$40 sps:$4 sm:$0xff]  }
  0xa7   :  { %1172 = vmatpush1.bf16.msra.mxu0 %v3594_v39  ;;  %v3685_v39 = vld [vmem:[#allocation7 + $0x298] ss:$40 sps:$4 sm:$0xff]  }
  0xa8   :  { %1213 = vmatpush1.bf16.msra.mxu1 %v3595_v40  ;;  %1173 = vmatprep.subr.bf16.mxu0 %v3596_v41  ;;  %v3690_v40 = vld [vmem:[#allocation7 + $0x2e4] ss:$40 sps:$4 sm:$0xff]  }
  0xa9   :  { %1214 = vmatprep.subr.bf16.mxu1 %v3598_v42  ;;  %v3693_v41 = vld [vmem:[#allocation7 + $0x2ec] ss:$40 sps:$4 sm:$0xff]   ;;  %v3688_v42 = vld [vmem:[#allocation7 + $0x2e0] ss:$40 sps:$4 sm:$0xff]  }
  0xab   :  { %1174 = vmatpush1.bf16.msra.mxu0 %v3600_v43  ;;  %v3691_v43 = vld [vmem:[#allocation7 + $0x2e8] ss:$40 sps:$4 sm:$0xff]  }
  0xac   :  { %1215 = vmatpush1.bf16.msra.mxu1 %v3601_v44  ;;  %1175 = vmatprep.subr.bf16.mxu0 %v3602_v45  ;;  %v3696_v44 = vld [vmem:[#allocation7 + $0x334] ss:$40 sps:$4 sm:$0xff]  }
  0xad   :  { %1216 = vmatprep.subr.bf16.mxu1 %v3604_v46  ;;  %v3699_v45 = vld [vmem:[#allocation7 + $0x33c] ss:$40 sps:$4 sm:$0xff]   ;;  %v3694_v46 = vld [vmem:[#allocation7 + $0x330] ss:$40 sps:$4 sm:$0xff]  }
  0xaf   :  { %1176 = vmatpush1.bf16.msra.mxu0 %v3606_v48  ;;  %v3702_v48 = vld [vmem:[#allocation7 + $0x384] ss:$40 sps:$4 sm:$0xff]  }
  0xb0   :  { %1217 = vmatpush1.bf16.msra.mxu1 %v3607_v50  ;;  %1177 = vmatprep.subr.bf16.mxu0 %v3608_v51  ;;  %v3705_v50 = vld [vmem:[#allocation7 + $0x38c] ss:$40 sps:$4 sm:$0xff]   ;;  %v3700_v51 = vld [vmem:[#allocation7 + $0x380] ss:$40 sps:$4 sm:$0xff]  }
  0xb1   :  { %1218 = vmatprep.subr.bf16.mxu1 %v3610_v52  ;;  %v3703_v52 = vld [vmem:[#allocation7 + $0x388] ss:$40 sps:$4 sm:$0xff]  }
  0xb3   :  { %1178 = vmatpush1.bf16.msra.mxu0 %v3612_v53  ;;  %v3708_v53 = vld [vmem:[#allocation7 + $0x3d4] ss:$40 sps:$4 sm:$0xff]  }
  0xb4   :  { %1219 = vmatpush1.bf16.msra.mxu1 %v3613_v54  ;;  %1179 = vmatprep.subr.bf16.mxu0 %v3614_v55  ;;  %v3711_v54 = vld [vmem:[#allocation7 + $0x3dc] ss:$40 sps:$4 sm:$0xff]   ;;  %v3706_v55 = vld [vmem:[#allocation7 + $0x3d0] ss:$40 sps:$4 sm:$0xff]  }
  0xb5   :  { %1220 = vmatprep.subr.bf16.mxu1 %v3616_v56  ;;  %v3709_v56 = vld [vmem:[#allocation7 + $0x3d8] ss:$40 sps:$4 sm:$0xff]  }
  0xb7   :  { %1180 = vmatpush1.bf16.msra.mxu0 %v3618_v57  ;;  %v3714_v57 = vld [vmem:[#allocation7 + $0x424] ss:$40 sps:$4 sm:$0xff]  }
  0xb8   :  { %1221 = vmatpush1.bf16.msra.mxu1 %v3619_v58  ;;  %1181 = vmatprep.subr.bf16.mxu0 %v3620_v59  ;;  %v3717_v58 = vld [vmem:[#allocation7 + $0x42c] ss:$40 sps:$4 sm:$0xff]   ;;  %v3712_v59 = vld [vmem:[#allocation7 + $0x420] ss:$40 sps:$4 sm:$0xff]  }
  0xb9   :  { %1222 = vmatprep.subr.bf16.mxu1 %v3622_v60  ;;  %v3715_v60 = vld [vmem:[#allocation7 + $0x428] ss:$40 sps:$4 sm:$0xff]  }
  0xbb   :  { %1182 = vmatpush1.bf16.msra.mxu0 %v3624_v61  ;;  %v3720_v61 = vld [vmem:[#allocation7 + $0x474] ss:$40 sps:$4 sm:$0xff]  }
  0xbc   :  { %1223 = vmatpush1.bf16.msra.mxu1 %v3625_v62  ;;  %1183 = vmatprep.subr.bf16.mxu0 %v3626_v63  ;;  %v3723_v62 = vld [vmem:[#allocation7 + $0x47c] ss:$40 sps:$4 sm:$0xff]   ;;  %v3718_v63 = vld [vmem:[#allocation7 + $0x470] ss:$40 sps:$4 sm:$0xff]  }
  0xbd   :  { %1224 = vmatprep.subr.bf16.mxu1 %v3628_v0  ;;  %v3721_v0 = vld [vmem:[#allocation7 + $0x478] ss:$40 sps:$4 sm:$0xff]  }
  0xbf   :  { %1184 = vmatpush1.bf16.msra.mxu0 %v3630_v1  ;;  %v3726_v1 = vld [vmem:[#allocation7 + $0x4c4] ss:$40 sps:$4 sm:$0xff]  }
  0xc0   :  { %1225 = vmatpush1.bf16.msra.mxu1 %v3631_v2  ;;  %1235 = vmatprep.subr.bf16.mxu0 %v3636_v3  ;;  %v3729_v2 = vld [vmem:[#allocation7 + $0x4cc] ss:$40 sps:$4 sm:$0xff]   ;;  %v3724_v3 = vld [vmem:[#allocation7 + $0x4c0] ss:$40 sps:$4 sm:$0xff]  }
  0xc1   :  { %1276 = vmatprep.subr.bf16.mxu1 %v3639_v4  ;;  %v3727_v4 = vld [vmem:[#allocation7 + $0x4c8] ss:$40 sps:$4 sm:$0xff]  }
  0xc2   :  { %1186 = vmatmul.mubr.bf16.vlgmr.msra.gmra.mrb[0].mxu0 %v4131_v5 }
  0xc3   :  { %1227 = vmatmul.mubr.bf16.vlgmr.msra.gmra.mrb[0].mxu1 %v4131_v5  ;;  %1236 = vmatpush1.bf16.msra.mxu0 %v3634_v6  ;;  %v3732_v6 = vld [vmem:[#allocation7 + $0x24] ss:$40 sps:$4 sm:$0xff]  }
  0xc4   :  { %1277 = vmatpush1.bf16.msra.mxu1 %v3637_v7  ;;  %1237 = vmatprep.subr.bf16.mxu0 %v3642_v8  ;;  %v3778_v7 = vld [vmem:[#allocation8 + $0xc] ss:$20 sps:$4 sm:$0x1f]   ;;  %v3782_v8 = vld [vmem:[#allocation8 + $0x8] ss:$20 sps:$4 sm:$0x1f]  }
  0xc5   :  { %1278 = vmatprep.subr.bf16.mxu1 %v3645_v9  ;;  %1267 = vmatprep.mubr.bf16.mxu0 %v4127_v49  ;;  %v3730_v9 = vld [vmem:[#allocation7 + $0x20] ss:$40 sps:$4 sm:$0xff]  }
  0xc6   :  { %1308 = vmatprep.mubr.bf16.mxu1 %v4127_v49 }
  0xc7   :  { %1238 = vmatpush1.bf16.msra.mxu0 %v3640_v10  ;;  %v3735_v10 = vld [vmem:[#allocation7 + $0x74] ss:$40 sps:$4 sm:$0xff]  }
  0xc8   :  { %1279 = vmatpush1.bf16.msra.mxu1 %v3643_v11  ;;  %1239 = vmatprep.subr.bf16.mxu0 %v3648_v12  ;;  %v1432_v11 = vsel %vm1424_vm0, %v3782_v8, 0  ;;  %v3733_v12 = vld [vmem:[#allocation7 + $0x70] ss:$40 sps:$4 sm:$0xff]  }
  0xc9   :  { %1280 = vmatprep.subr.bf16.mxu1 %v3651_v13  ;;  %v3738_v13 = vld [vmem:[#allocation7 + $0xc4] ss:$40 sps:$4 sm:$0xff]  }
  0xcb   :  { %1240 = vmatpush1.bf16.msra.mxu0 %v3646_v14  ;;  %v3784_v14 = vld [vmem:[#allocation8 + $0x10] ss:$20 sps:$4 sm:$0x1f]  }
  0xcc   :  { %1281 = vmatpush1.bf16.msra.mxu1 %v3649_v15  ;;  %1241 = vmatprep.subr.bf16.mxu0 %v3654_v16  ;;  %v3964_v15 = vmov 0   ;;  %v3965_v16 = vmov 0.0  }
  0xcd   :  { %1282 = vmatprep.subr.bf16.mxu1 %v3657_v17  ;;  %v3736_v17 = vld [vmem:[#allocation7 + $0xc0] ss:$40 sps:$4 sm:$0xff]  }
  0xcf   :  { %1242 = vmatpush1.bf16.msra.mxu0 %v3652_v18  ;;  %v4143_v18 = vld [vmem:[#allocation5] sm:$0xf] }
  0xd0   :  { %1283 = vmatpush1.bf16.msra.mxu1 %v3655_v19  ;;  %1243 = vmatprep.subr.bf16.mxu0 %v3660_v20  ;;  %v3741_v19 = vld [vmem:[#allocation7 + $0x114] ss:$40 sps:$4 sm:$0xff]   ;;  %v1438_v20 = vsel %vm1424_vm0, %v3784_v14, 0 }
  0xd1   :  { %1284 = vmatprep.subr.bf16.mxu1 %v3663_v21  ;;  %v3744_v21 = vld [vmem:[#allocation7 + $0x164] ss:$40 sps:$4 sm:$0xff]  }
  0xd3   :  { %1244 = vmatpush1.bf16.msra.mxu0 %v3658_v22  ;;  %v3742_v22 = vld [vmem:[#allocation7 + $0x160] ss:$40 sps:$4 sm:$0xff]  }
  0xd4   :  { %1285 = vmatpush1.bf16.msra.mxu1 %v3661_v23  ;;  %1245 = vmatprep.subr.bf16.mxu0 %v3666_v24  ;;  %v3747_v23 = vld [vmem:[#allocation7 + $0x1b4] ss:$40 sps:$4 sm:$0xff]   ;;  %v3745_v24 = vld [vmem:[#allocation7 + $0x1b0] ss:$40 sps:$4 sm:$0xff]  }
  0xd5   :  { %1286 = vmatprep.subr.bf16.mxu1 %v3669_v25  ;;  %v3750_v25 = vld [vmem:[#allocation7 + $0x204] ss:$40 sps:$4 sm:$0xff]  }
  0xd7   :  { %1246 = vmatpush1.bf16.msra.mxu0 %v3664_v26  ;;  %v3748_v26 = vld [vmem:[#allocation7 + $0x200] ss:$40 sps:$4 sm:$0xff]  }
  0xd8   :  { %1287 = vmatpush1.bf16.msra.mxu1 %v3667_v27  ;;  %1247 = vmatprep.subr.bf16.mxu0 %v3672_v28  ;;  %v3753_v27 = vld [vmem:[#allocation7 + $0x254] ss:$40 sps:$4 sm:$0xff]   ;;  %v3751_v28 = vld [vmem:[#allocation7 + $0x250] ss:$40 sps:$4 sm:$0xff]  }
  0xd9   :  { %1288 = vmatprep.subr.bf16.mxu1 %v3675_v29  ;;  %v3756_v29 = vld [vmem:[#allocation7 + $0x2a4] ss:$40 sps:$4 sm:$0xff]  }
  0xdb   :  { %1248 = vmatpush1.bf16.msra.mxu0 %v3670_v30  ;;  %v3754_v30 = vld [vmem:[#allocation7 + $0x2a0] ss:$40 sps:$4 sm:$0xff]  }
  0xdc   :  { %1289 = vmatpush1.bf16.msra.mxu1 %v3673_v31  ;;  %1249 = vmatprep.subr.bf16.mxu0 %v3678_v32  ;;  %v3759_v31 = vld [vmem:[#allocation7 + $0x2f4] ss:$40 sps:$4 sm:$0xff]   ;;  %v3757_v32 = vld [vmem:[#allocation7 + $0x2f0] ss:$40 sps:$4 sm:$0xff]  }
  0xdd   :  { %1290 = vmatprep.subr.bf16.mxu1 %v3681_v33  ;;  %v3762_v33 = vld [vmem:[#allocation7 + $0x344] ss:$40 sps:$4 sm:$0xff]  }
  0xdf   :  { %1250 = vmatpush1.bf16.msra.mxu0 %v3676_v34  ;;  %v3760_v34 = vld [vmem:[#allocation7 + $0x340] ss:$40 sps:$4 sm:$0xff]  }
  0xe0   :  { %1291 = vmatpush1.bf16.msra.mxu1 %v3679_v35  ;;  %1251 = vmatprep.subr.bf16.mxu0 %v3684_v36  ;;  %v3765_v35 = vld [vmem:[#allocation7 + $0x394] ss:$40 sps:$4 sm:$0xff]   ;;  %v3763_v36 = vld [vmem:[#allocation7 + $0x390] ss:$40 sps:$4 sm:$0xff]  }
  0xe1   :  { %1292 = vmatprep.subr.bf16.mxu1 %v3687_v37  ;;  %v3768_v37 = vld [vmem:[#allocation7 + $0x3e4] ss:$40 sps:$4 sm:$0xff]  }
  0xe3   :  { %1252 = vmatpush1.bf16.msra.mxu0 %v3682_v38  ;;  %v3766_v38 = vld [vmem:[#allocation7 + $0x3e0] ss:$40 sps:$4 sm:$0xff]  }
  0xe4   :  { %1293 = vmatpush1.bf16.msra.mxu1 %v3685_v39  ;;  %1253 = vmatprep.subr.bf16.mxu0 %v3690_v40  ;;  %v3771_v39 = vld [vmem:[#allocation7 + $0x434] ss:$40 sps:$4 sm:$0xff]   ;;  %v3769_v40 = vld [vmem:[#allocation7 + $0x430] ss:$40 sps:$4 sm:$0xff]  }
  0xe5   :  { %1294 = vmatprep.subr.bf16.mxu1 %v3693_v41  ;;  %v3774_v41 = vld [vmem:[#allocation7 + $0x484] ss:$40 sps:$4 sm:$0xff]  }
  0xe7   :  { %1254 = vmatpush1.bf16.msra.mxu0 %v3688_v42  ;;  %v3772_v42 = vld [vmem:[#allocation7 + $0x480] ss:$40 sps:$4 sm:$0xff]  }
  0xe8   :  { %1295 = vmatpush1.bf16.msra.mxu1 %v3691_v43  ;;  %1255 = vmatprep.subr.bf16.mxu0 %v3696_v44  ;;  %v3777_v43 = vld [vmem:[#allocation7 + $0x4d4] ss:$40 sps:$4 sm:$0xff]   ;;  %v3775_v44 = vld [vmem:[#allocation7 + $0x4d0] ss:$40 sps:$4 sm:$0xff]  }
  0xe9   :  { %1296 = vmatprep.subr.bf16.mxu1 %v3699_v45  ;;  %v3780_v45 = vld [vmem:[#allocation8 + $0x4] ss:$20 sps:$4 sm:$0x1f]  }
  0xeb   :  { %1256 = vmatpush1.bf16.msra.mxu0 %v3694_v46  ;;  %v3783_v46 = vld [vmem:[#allocation8] ss:$20 sps:$4 sm:$0x1f]  }
  0xec   :  { %1297 = vmatpush1.bf16.msra.mxu1 %v3697_v47  ;;  %1257 = vmatprep.subr.bf16.mxu0 %v3702_v48  ;;  %v1426_v47 = vsel %vm1424_vm0, %v3783_v46, 0  ;;  %v1697_v48 = vld [vmem:[#allocation13] sm:$0xff] }
  0xed   :  { %1298 = vmatprep.subr.bf16.mxu1 %v3705_v50  ;;  %v1701_v50 = vld [vmem:[#allocation13 + $0x20] sm:$0xff] }
  0xef   :  { %1258 = vmatpush1.bf16.msra.mxu0 %v3700_v51  ;;  %v1699_v51 = vld [vmem:[#allocation13 + $0x10] sm:$0xff] }
  0xf0   :  { %1299 = vmatpush1.bf16.msra.mxu1 %v3703_v52  ;;  %1259 = vmatprep.subr.bf16.mxu0 %v3708_v53  ;;  %v3318_v52 = vcombine.low %v1697_v48, %v1701_v50  ;;  %v3319_v53 = vcombine.high %v1697_v48, %v1701_v50 }
  0xf1   :  { %1300 = vmatprep.subr.bf16.mxu1 %v3711_v54  ;;  %v1703_v54 = vld [vmem:[#allocation13 + $0x30] sm:$0xff] }
  0xf3   :  { %1260 = vmatpush1.bf16.msra.mxu0 %v3706_v55  ;;  %v1705_v55 = vld [vmem:[#allocation13 + $0x40] sm:$0xff] }
  0xf4   :  { %1301 = vmatpush1.bf16.msra.mxu1 %v3709_v56  ;;  %1261 = vmatprep.subr.bf16.mxu0 %v3714_v57  ;;  %v1709_v56 = vld [vmem:[#allocation13 + $0x60] sm:$0xff]  ;;  %v3322_v57 = vcombine.low %v1699_v51, %v1703_v54 }
  0xf5   :  { %1302 = vmatprep.subr.bf16.mxu1 %v3717_v58  ;;  %v3323_v58 = vcombine.high %v1699_v51, %v1703_v54  ;;  %v1737_v51 = vld [vmem:[#allocation13 + $0x140] sm:$0xff] }
  0xf7   :  { %1262 = vmatpush1.bf16.msra.mxu0 %v3712_v59  ;;  %v3327_v59 = vcombine.high %v1705_v55, %v1709_v56 }
  0xf8   :  { %1303 = vmatpush1.bf16.msra.mxu1 %v3715_v60  ;;  %1263 = vmatprep.subr.bf16.mxu0 %v3720_v61  ;;  %v1711_v60 = vld [vmem:[#allocation13 + $0x70] sm:$0xff]  ;;  %v1713_v61 = vld [vmem:[#allocation13 + $0x80] sm:$0xff] }
  0xf9   :  { %1304 = vmatprep.subr.bf16.mxu1 %v3723_v62 }
  0xfb   :  { %1264 = vmatpush1.bf16.msra.mxu0 %v3718_v63  ;;  %v1717_v63 = vld [vmem:[#allocation13 + $0xa0] sm:$0xff] }
  0xfc   :  { %1305 = vmatpush1.bf16.msra.mxu1 %v3721_v0  ;;  %1265 = vmatprep.subr.bf16.mxu0 %v3726_v1  ;;  %v1715_v0 = vld [vmem:[#allocation13 + $0x90] sm:$0xff] }
  0xfd   :  { %1306 = vmatprep.subr.bf16.mxu1 %v3729_v2  ;;  %v1719_v1 = vld [vmem:[#allocation13 + $0xb0] sm:$0xff]  ;;  %v3326_v2 = vcombine.low %v1705_v55, %v1709_v56 }
  0xfe   :  { %v3338_v8 = vcombine.low %v1715_v0, %v1719_v1  ;;  %v1743_v55 = vld [vmem:[#allocation13 + $0x170] sm:$0xff] }
  0xff   :  { %1266 = vmatpush1.bf16.msra.mxu0 %v3724_v3 }
 0x100   :  { %1307 = vmatpush1.bf16.msra.mxu1 %v3727_v4  ;;  %1317 = vmatprep.subr.bf16.mxu0 %v3732_v6  ;;  %v3335_v4 = vcombine.high %v1713_v61, %v1717_v63  ;;  %v3339_v6 = vcombine.high %v1715_v0, %v1719_v1 }
 0x101   :  { %3315 = vmatprep.subr.msk.bf16.mxu1 %vm1424_vm0, %v3778_v7  ;;  %v3334_v7 = vcombine.low %v1713_v61, %v1717_v63 }
 0x102   :  { %1268 = vmatmul.mubr.bf16.vlgmr.msra.gmra.mrb[4].mxu0 %v4131_v5 }
 0x103   :  { %1309 = vmatmul.mubr.bf16.vlgmr.msra.gmra.mrb[4].mxu1 %v4131_v5  ;;  %1318 = vmatpush1.bf16.msra.mxu0 %v3730_v9  ;;  %v296_v9 = vlaneseq }
 0x104   :  { %1349 = vmatprep.mubr.bf16.mxu0 %v4127_v49  ;;  %1319 = vmatprep.subr.bf16.mxu0 %v3735_v10  ;;  %v3739_v49 = vld [vmem:[#allocation7 + $0x110] ss:$40 sps:$4 sm:$0xff]  }
 0x105   :  { %1482 = vmatpush1.bf16.msra.mxu1 %v1432_v11  ;;  %1513 = vmatprep.mubr.bf16.mxu1 %v3964_v15  ;;  %v4158_v10 = vshrl.u32 %v296_v9, 7 }
 0x106   :  { %3514 = vmatprep.subr.bf16.mxu1 %v3965_v16 }
 0x107   :  { %1320 = vmatpush1.bf16.msra.mxu0 %v3733_v12  ;;  %v4161_v11 = vsub.s32 0, %v4158_v10  ;;  %v4164_v12 = vsub.s32 2, %v4158_v10  ;;  %v4172_v14 = vsub.s32 1, %v4158_v10 }
 0x108   :  { %1321 = vmatprep.subr.bf16.mxu0 %v3738_v13  ;;  %v4169_v13 = vld [vmem:[%s4301_s3] sm:$0xff] }
 0x10b   :  { %3316 = vmatmul.mubr.msk.bf16.vlgmr.msra.gmra.mrb[8].mxu1 %vm1420_vm1, %v4143_v18  ;;  %1322 = vmatpush1.bf16.msra.mxu0 %v3736_v17  ;;  %v299_v17 = vrot.slane %v4169_v13, %v4161_v11 }
 0x10c   :  { %3515 = vmatpush3.bf16.msra.mxu1 %v1438_v20  ;;  %1323 = vmatprep.subr.bf16.mxu0 %v3741_v19  ;;  %v303_v19 = vrot.slane %v4169_v13, %v4172_v14 }
 0x10d   :  { %3516 = vmatprep.mubr.msk.bf16.mxu1 %vm3966_vm2, %v3965_v16  ;;  %2081 = vmatprep.subr.bf16.mxu1 %v3319_v53  ;;  %v4175_v16 = vsub.s32 3, %v4158_v10  ;;  %v1739_v53 = vld [vmem:[#allocation13 + $0x150] sm:$0xff] }
 0x10f   :  { %1324 = vmatpush1.bf16.msra.mxu0 %v3739_v49  ;;  %v311_v20 = vrot.slane %v4169_v13, %v4175_v16  ;;  %v1721_v49 = vld [vmem:[#allocation13 + $0xc0] sm:$0xff] }
 0x110   :  { %1325 = vmatprep.subr.bf16.mxu0 %v3744_v21  ;;  %v1725_v21 = vld [vmem:[#allocation13 + $0xe0] sm:$0xff] }
 0x113   :  { %3517 = vmatmul.mubr.msk.bf16.vlgmr.msra.gmra.mrb[12].mxu1 %vm1420_vm1, %v4143_v18  ;;  %1326 = vmatpush1.bf16.msra.mxu0 %v3742_v22  ;;  %v1723_v22 = vld [vmem:[#allocation13 + $0xd0] sm:$0xff] }
 0x114   :  { %2113 = vmatprep.mubr.bf16.mxu1 %v3964_v15  ;;  %1327 = vmatprep.subr.bf16.mxu0 %v3747_v23  ;;  %v3343_v23 = vcombine.high %v1721_v49, %v1725_v21 }
 0x115   :  { %2082 = vmatpush1.bf16.msra.mxu1 %v3318_v52  ;;  %v1741_v52 = vld [vmem:[#allocation13 + $0x160] sm:$0xff] }
 0x116   :  { %2083 = vmatprep.subr.bf16.mxu1 %v3327_v59  ;;  %v3359_v54 = vcombine.high %v1737_v51, %v1741_v52  ;;  %v3358_v56 = vcombine.low %v1737_v51, %v1741_v52  ;;  %v1745_v59 = vld [vmem:[#allocation13 + $0x180] sm:$0xff] }
 0x117   :  { %1328 = vmatpush1.bf16.msra.mxu0 %v3745_v24  ;;  %v1727_v24 = vld [vmem:[#allocation13 + $0xf0] sm:$0xff] }
 0x118   :  { %1329 = vmatprep.subr.bf16.mxu0 %v3750_v25 }
 0x119   :  { %2084 = vmatpush1.bf16.msra.mxu1 %v3326_v2  ;;  %v1753_v2 = vld [vmem:[#allocation13 + $0x1c0] sm:$0xff] }
 0x11a   :  { %2085 = vmatprep.subr.bf16.mxu1 %v3335_v4  ;;  %v1755_v4 = vld [vmem:[#allocation13 + $0x1d0] sm:$0xff] }
 0x11b   :  { %1330 = vmatpush1.bf16.msra.mxu0 %v3748_v26 }
 0x11c   :  { %1331 = vmatprep.subr.bf16.mxu0 %v3753_v27  ;;  %v3342_v27 = vcombine.low %v1721_v49, %v1725_v21  ;;  %v4205_v21 = vld [vmem:[#allocation11 + $0x20] sm:$0xff] }
 0x11d   :  { %2086 = vmatpush1.bf16.msra.mxu1 %v3334_v7  ;;  %v1759_v7 = vld [vmem:[#allocation13 + $0x1f0] sm:$0xff] }
 0x11e   :  { %2087 = vmatprep.subr.bf16.mxu1 %v3343_v23  ;;  %v3378_v9 = vcombine.low %v1755_v4, %v1759_v7 }
 0x11f   :  { %1332 = vmatpush1.bf16.msra.mxu0 %v3751_v28  ;;  %v3346_v28 = vcombine.low %v1723_v22, %v1727_v24 }
 0x120   :  { %1333 = vmatprep.subr.bf16.mxu0 %v3756_v29  ;;  %v3347_v29 = vcombine.high %v1723_v22, %v1727_v24 }
 0x121   :  { %2088 = vmatpush1.bf16.msra.mxu1 %v3342_v27  ;;  %v318_v27 = vsub.s32 5, %v4158_v10 }
 0x123   :  { %1334 = vmatpush1.bf16.msra.mxu0 %v3754_v30 }
 0x124   :  { %1335 = vmatprep.subr.bf16.mxu0 %v3759_v31 }
 0x127   :  { %1336 = vmatpush1.bf16.msra.mxu0 %v3757_v32 }
 0x128   :  { %1337 = vmatprep.subr.bf16.mxu0 %v3762_v33 }
 0x12b   :  { %1338 = vmatpush1.bf16.msra.mxu0 %v3760_v34 }
 0x12c   :  { %1339 = vmatprep.subr.bf16.mxu0 %v3765_v35 }
 0x12f   :  { %1340 = vmatpush1.bf16.msra.mxu0 %v3763_v36 }
 0x130   :  { %1341 = vmatprep.subr.bf16.mxu0 %v3768_v37 }
 0x133   :  { %1342 = vmatpush1.bf16.msra.mxu0 %v3766_v38  ;;  %v1729_v38 = vld [vmem:[#allocation13 + $0x100] sm:$0xff] }
 0x134   :  { %1343 = vmatprep.subr.bf16.mxu0 %v3771_v39  ;;  %v1733_v39 = vld [vmem:[#allocation13 + $0x120] sm:$0xff] }
 0x137   :  { %1344 = vmatpush1.bf16.msra.mxu0 %v3769_v40  ;;  %v1731_v40 = vld [vmem:[#allocation13 + $0x110] sm:$0xff] }
 0x138   :  { %1345 = vmatprep.subr.bf16.mxu0 %v3774_v41 }
 0x13b   :  { %1346 = vmatpush1.bf16.msra.mxu0 %v3772_v42 }
 0x13c   :  { %1347 = vmatprep.subr.bf16.mxu0 %v3777_v43 }
 0x13f   :  { %1348 = vmatpush1.bf16.msra.mxu0 %v3775_v44  ;;  %v3351_v44 = vcombine.high %v1729_v38, %v1733_v39 }
 0x140   :  { %3313 = vmatprep.subr.msk.bf16.mxu0 %vm1424_vm0, %v3780_v45  ;;  %v1735_v45 = vld [vmem:[#allocation13 + $0x130] sm:$0xff] }
 0x141   :  { %v3354_v48 = vcombine.low %v1731_v40, %v1735_v45  ;;  %v3355_v50 = vcombine.high %v1731_v40, %v1735_v45  ;;  %2089 = vmatprep.subr.bf16.mxu1 %v3351_v44 }
 0x142   :  { %1350 = vmatmul.mubr.bf16.vlgmr.msra.gmra.mrb[8].mxu0 %v4131_v5  ;;  %v1707_v5 = vld [vmem:[#allocation13 + $0x50] sm:$0xff] }
 0x143   :  { %1441 = vmatpush1.bf16.msra.mxu0 %v1426_v47  ;;  %1472 = vmatprep.mubr.bf16.mxu0 %v3964_v15  ;;  %v3331_v62 = vcombine.high %v1707_v5, %v1711_v60  ;;  %v3330_v3 = vcombine.low %v1707_v5, %v1711_v60  ;;  %v3350_v47 = vcombine.low %v1729_v38, %v1733_v39  ;;  %v1749_v5 = vld [vmem:[#allocation13 + $0x1a0] sm:$0xff]  ;;  %v1747_v60 = vld [vmem:[#allocation13 + $0x190] sm:$0xff] }
 0x144   :  { %2163 = vmatprep.subr.bf16.mxu0 %v3323_v58  ;;  %v3363_v58 = vcombine.high %v1739_v53, %v1743_v55  ;;  %v3367_v61 = vcombine.high %v1745_v59, %v1749_v5  ;;  %v3366_v63 = vcombine.low %v1745_v59, %v1749_v5 }
 0x145   :  { %2090 = vmatpush1.bf16.msra.mxu1 %v3350_v47 }
 0x146   :  { %2091 = vmatprep.subr.bf16.mxu1 %v3359_v54 }
 0x149   :  { %2092 = vmatpush1.bf16.msra.mxu1 %v3358_v56 }
 0x14a   :  { %3314 = vmatmul.mubr.msk.bf16.vlgmr.msra.gmra.mrb[12].mxu0 %vm1420_vm1, %v4143_v18  ;;  %v307_v18 = vrot.slane %v4169_v13, %v4164_v12  ;;  %2093 = vmatprep.subr.bf16.mxu1 %v3367_v61 }
 0x14b   :  { %2195 = vmatprep.mubr.bf16.mxu0 %v3964_v15  ;;  %2164 = vmatpush1.bf16.msra.mxu0 %v3322_v57  ;;  %v3362_v57 = vcombine.low %v1739_v53, %v1743_v55 }
 0x14c   :  { %2165 = vmatprep.subr.bf16.mxu0 %v3331_v62  ;;  %v1751_v62 = vld [vmem:[#allocation13 + $0x1b0] sm:$0xff] }
 0x14d   :  { %v3370_v0 = vcombine.low %v1747_v60, %v1751_v62  ;;  %v3371_v1 = vcombine.high %v1747_v60, %v1751_v62  ;;  %2094 = vmatpush1.bf16.msra.mxu1 %v3366_v63 }
 0x14f   :  { %2166 = vmatpush1.bf16.msra.mxu0 %v3330_v3  ;;  %v1757_v3 = vld [vmem:[#allocation13 + $0x1e0] sm:$0xff] }
 0x150   :  { %2167 = vmatprep.subr.bf16.mxu0 %v3339_v6  ;;  %v3375_v6 = vcombine.high %v1753_v2, %v1757_v3 }
 0x152   :  { %2095 = vmatprep.subr.bf16.mxu1 %v3375_v6 }
 0x153   :  { %2168 = vmatpush1.bf16.msra.mxu0 %v3338_v8  ;;  %v3374_v8 = vcombine.low %v1753_v2, %v1757_v3 }
 0x154   :  { %2169 = vmatprep.subr.bf16.mxu0 %v3347_v29 }
 0x155   :  { %2096 = vmatpush1.bf16.msra.mxu1 %v3374_v8 }
 0x157   :  { %2170 = vmatpush1.bf16.msra.mxu0 %v3346_v28  ;;  %v326_v28 = vsub.s32 7, %v4158_v10 }
 0x158   :  { %2171 = vmatprep.subr.bf16.mxu0 %v3355_v50 }
 0x15b   :  { %2172 = vmatpush1.bf16.msra.mxu0 %v3354_v48 }
 0x15c   :  { %2173 = vmatprep.subr.bf16.mxu0 %v3363_v58 }
 0x15f   :  { %2174 = vmatpush1.bf16.msra.mxu0 %v3362_v57 }
 0x160   :  { %2175 = vmatprep.subr.bf16.mxu0 %v3371_v1 }
 0x163   :  { %2176 = vmatpush1.bf16.msra.mxu0 %v3370_v0  ;;  %v1372_v0 = vld [vmem:[#allocation10] sm:$0x1f] }
 0x164   :  { %v1381_v6 = vrot.slane %v1372_v0, %v4172_v14 }
 0x195   :  { %v1187_v25 = vpop.f32.mrb[0].mxu0 }
 0x196   :  { %v1228_v26 = vpop.f32.mrb[0].mxu1  ;;  %v4185_v30 = vadd.f32 %v1187_v25, %v299_v17  ;;  %v1189_v32 = vpop.f32.mrb[1].mxu0  ;;  %v3379_v17 = vcombine.high %v1755_v4, %v1759_v7  ;;  %v4214_v25 = vsub.s32 4, %v4158_v10  ;;  %v1377_v4 = vrot.slane %v1372_v0, %v4161_v11 }
 0x197   :  { %v4187_v31 = vadd.f32 %v1228_v26, %v307_v18  ;;  %v1230_v33 = vpop.f32.mrb[1].mxu1  ;;  %v4189_v34 = vadd.f32 %v1189_v32, %v303_v19  ;;  %v1191_v36 = vpop.f32.mrb[2].mxu0  ;;  %v4197_v18 = vld [vmem:[#allocation13 + $0x8] sm:$0xff]  ;;  %v322_v26 = vsub.s32 6, %v4158_v10  ;;  %v1385_v7 = vrot.slane %v1372_v0, %v4164_v12 }
 0x198   :  { %v4191_v35 = vadd.f32 %v1230_v33, %v311_v20  ;;  %v1232_v37 = vpop.f32.mrb[2].mxu1  ;;  %v1192_v42 = vpop.f32.mrb[3].mxu0  ;;  %2177 = vmatprep.subr.bf16.mxu0 %v3379_v17  ;;  %v4199_v19 = vld [vmem:[#allocation13 + $0x28] sm:$0xff]  ;;  %v4201_v20 = vld [vmem:[#allocation11] sm:$0xff]  ;;  %v315_v29 = vrot.slane %v4169_v13, %v4214_v25  ;;  %v319_v33 = vrot.slane %v4169_v13, %v318_v27  ;;  %v327_v36 = vrot.slane %v4169_v13, %v326_v28 }
 0x199   :  { %v1358_v41 = vmax.f32 %v4185_v30, %v4187_v31  ;;  %v1233_v43 = vpop.f32.mrb[3].mxu1  ;;  %2178 = vmatpush1.bf16.msra.mxu0 %v3378_v9  ;;  %v3321_v49 = vcombine.high %v4197_v18, %v4199_v19  ;;  %v3320_v22 = vcombine.low %v4197_v18, %v4199_v19  ;;  %v3382_v23 = vcombine.low %v4201_v20, %v4205_v21  ;;  %v293_v30 = vld [vmem:[%s4301_s3 + $0x8] sm:$0x3] }
 0x19a   :  { %v1359_v46 = vmax.f32 %v4189_v34, %v4191_v35  ;;  %v3383_v24 = vcombine.high %v4201_v20, %v4205_v21  ;;  %v323_v32 = vrot.slane %v4169_v13, %v322_v26  ;;  %v331_v31 = vrot.slane %v293_v30, %v4161_v11 }
 0x19b   :  { %2122 = vmatprep.subr.bf16.mxu1 %v3321_v49  ;;  %v1389_v49 = vrot.slane %v1372_v0, %v4175_v16 }
 0x19c   :  { %2885 = vmatprep.subr.bf16.mxu0 %v3383_v24 }
 0x1d5   :  { %v1269_v37 = vpop.f32.mrb[4].mxu0 }
 0x1d6   :  { %v1310_v38 = vpop.f32.mrb[4].mxu1  ;;  %v1270_v39 = vadd.f32 %v1269_v37, %v315_v29  ;;  %v1271_v40 = vpop.f32.mrb[5].mxu0 }
 0x1d7   :  { %v1311_v42 = vadd.f32 %v1310_v38, %v323_v32  ;;  %v1312_v43 = vpop.f32.mrb[5].mxu1  ;;  %v1272_v44 = vadd.f32 %v1271_v40, %v319_v33  ;;  %v1273_v45 = vpop.f32.mrb[6].mxu0  ;;  %v1393_v32 = vrot.slane %v1372_v0, %v4214_v25  ;;  %v1738_v0 = vld [vmem:[#allocation13 + $0x148] sm:$0xff] }
 0x1d8   :  { %v1313_v47 = vadd.f32 %v1312_v43, %v327_v36  ;;  %v1314_v48 = vpop.f32.mrb[6].mxu1  ;;  %v1360_v50 = vmax.f32 %v1358_v41, %v1270_v39  ;;  %v1274_v51 = vpop.f32.mrb[7].mxu0  ;;  %v335_v41 = vrot.slane %v293_v30, %v4172_v14  ;;  %v1706_v43 = vld [vmem:[#allocation13 + $0x48] sm:$0xff]  ;;  %v1593_v30 = vld [vmem:[#allocation11 + $0xc0] sm:$0xff] }
 0x1d9   :  { %v1315_v52 = vpop.f32.mrb[7].mxu1  ;;  %v1361_v13 = vmax.f32 %v1359_v46, %v1272_v44  ;;  %v1710_v44 = vld [vmem:[#allocation13 + $0x68] sm:$0xff]  ;;  %v1581_v48 = vld [vmem:[#allocation11 + $0x60] sm:$0xff] }
 0x1da   :  { %v1362_v53 = vmax.f32 %v1360_v50, %v1311_v42  ;;  %v3329_v51 = vcombine.high %v1706_v43, %v1710_v44  ;;  %v1714_v52 = vld [vmem:[#allocation13 + $0x88] sm:$0xff] }
 0x1db   :  { %v1363_v54 = vmax.f32 %v1361_v13, %v1313_v47  ;;  %v1577_v47 = vld [vmem:[#allocation11 + $0x40] sm:$0xff] }
 0x1dc   :  { %v3391_v13 = vcombine.high %v1577_v47, %v1581_v48 }
 0x1de   :  { %v1515_v55 = vpop.f32.mrb[8].mxu1 }
 0x1df   :  { %v1517_v56 = vpop.f32.mrb[9].mxu1  ;;  %v1516_v36 = vadd.f32 %v1515_v55, %v1385_v7  ;;  %v3328_v55 = vcombine.low %v1706_v43, %v1710_v44 }
 0x1e0   :  { %v1519_v57 = vpop.f32.mrb[10].mxu1  ;;  %v1518_v38 = vadd.f32 %v1517_v56, %v1389_v49  ;;  %v3390_v56 = vcombine.low %v1577_v47, %v1581_v48  ;;  %v1750_v49 = vld [vmem:[#allocation13 + $0x1a8] sm:$0xff]  ;;  %v1700_v48 = vld [vmem:[#allocation13 + $0x18] sm:$0xff] }
 0x1e1   :  { %v1520_v58 = vpop.f32.mrb[11].mxu1  ;;  %v1589_v57 = vld [vmem:[#allocation11 + $0xa0] sm:$0xff] }
 0x1e6   :  { %v1556_v59 = vpop.f32.mrb[12].mxu1 }
 0x1e7   :  { %v3518_v5 = vpop.f32.mrb[13].mxu1  ;;  %v1557_v40 = vadd.f32 %v1556_v59, %v1393_v32 }
 0x1e8   :  { %v1559_v60 = vpop.f32.mrb[14].mxu1 }
 0x1e9   :  { %v3519_v61 = vpop.f32.mrb[15].mxu1  ;;  %v1722_v60 = vld [vmem:[#allocation13 + $0xc8] sm:$0xff] }
 0x1ea   :  { %v1726_v61 = vld [vmem:[#allocation13 + $0xe8] sm:$0xff] }
 0x1eb   :  { %v3345_v20 = vcombine.high %v1722_v60, %v1726_v61 }
 0x215   :  { %v1351_v34 = vpop.f32.mrb[8].mxu0 }
 0x216   :  { %v1352_v35 = vadd.f32 %v1351_v34, %v331_v31  ;;  %v1353_v46 = vpop.f32.mrb[9].mxu0  ;;  %v1597_v31 = vld [vmem:[#allocation11 + $0xe0] sm:$0xff] }
 0x217   :  { %v1354_v62 = vadd.f32 %v1353_v46, %v335_v41  ;;  %v1355_v63 = vpop.f32.mrb[10].mxu0  ;;  %v3407_v21 = vcombine.high %v1593_v30, %v1597_v31  ;;  %v1601_v41 = vld [vmem:[#allocation11 + $0x100] sm:$0xff]  ;;  %v3406_v46 = vcombine.low %v1593_v30, %v1597_v31 }
 0x218   :  { %v4241_v1 = vmax.f32 %v1362_v53, %v1352_v35  ;;  %v1356_v2 = vpop.f32.mrb[11].mxu0  ;;  %v1718_v53 = vld [vmem:[#allocation13 + $0xa8] sm:$0xff]  ;;  %v1605_v34 = vld [vmem:[#allocation11 + $0x120] sm:$0xff]  ;;  %v3344_v35 = vcombine.low %v1722_v60, %v1726_v61 }
 0x219   :  { %v1365_v3 = vmax.f32 %v1363_v54, %v1354_v62  ;;  %v1585_v54 = vld [vmem:[#allocation11 + $0x80] sm:$0xff]  ;;  %v3337_v59 = vcombine.high %v1714_v52, %v1718_v53  ;;  %v3336_v18 = vcombine.low %v1714_v52, %v1718_v53  ;;  %v3415_v63 = vcombine.high %v1601_v41, %v1605_v34  ;;  %v1742_v2 = vld [vmem:[#allocation13 + $0x168] sm:$0xff] }
 0x21a   :  { %v3399_v5 = vcombine.high %v1585_v54, %v1589_v57  ;;  %v3398_v19 = vcombine.low %v1585_v54, %v1589_v57  ;;  %v3414_v7 = vcombine.low %v1601_v41, %v1605_v34  ;;  %v3360_v32 = vcombine.low %v1738_v0, %v1742_v2  ;;  %v1633_v52 = vld [vmem:[#allocation11 + $0x200] sm:$0xff] }
 0x21b   :  { %v4250_v58 = vpack.c.bf16 %v1365_v3, %v1365_v3  ;;  %v1609_v3 = vld [vmem:[#allocation11 + $0x140] sm:$0xff] }
 0x21c   :  { %v1645_v60 = vld [vmem:[#allocation11 + $0x260] sm:$0xff] }
 0x21d   :  { %v1474_v8 = vpop.f32.mrb[12].mxu0 }
 0x21e   :  { %v1475_v9 = vadd.f32 %v1474_v8, %v1377_v4  ;;  %v1476_v17 = vpop.f32.mrb[13].mxu0  ;;  %v1613_v4 = vld [vmem:[#allocation11 + $0x160] sm:$0xff]  ;;  %v3361_v8 = vcombine.high %v1738_v0, %v1742_v2 }
 0x21f   :  { %v1477_v24 = vadd.f32 %v1476_v17, %v1381_v6  ;;  %v1478_v29 = vpop.f32.mrb[14].mxu0  ;;  %v1746_v17 = vld [vmem:[#allocation13 + $0x188] sm:$0xff]  ;;  %v1661_v0 = vld [vmem:[#allocation11 + $0x2e0] sm:$0xff] }
 0x220   :  { %v1479_v33 = vpop.f32.mrb[15].mxu0  ;;  %v1621_v29 = vld [vmem:[#allocation11 + $0x1a0] sm:$0xff]  ;;  %v3368_v43 = vcombine.low %v1746_v17, %v1750_v49 }
 0x221   :  { %v1562_v37 = vmax.f32 %v1475_v9, %v1477_v24  ;;  %v3423_v9 = vcombine.high %v1609_v3, %v1613_v4  ;;  %v1617_v24 = vld [vmem:[#allocation11 + $0x180] sm:$0xff]  ;;  %v3422_v33 = vcombine.low %v1609_v3, %v1613_v4 }
 0x222   :  { %v3430_v44 = vcombine.low %v1617_v24, %v1621_v29 }
 0x223   :  { %v1563_v39 = vmax.f32 %v1562_v37, %v1516_v36  ;;  %v3369_v36 = vcombine.high %v1746_v17, %v1750_v49  ;;  %v3431_v37 = vcombine.high %v1617_v24, %v1621_v29  ;;  %v1669_v17 = vld [vmem:[#allocation11 + $0x320] sm:$0xff] }
 0x225   :  { %v1564_v42 = vmax.f32 %v1563_v39, %v1518_v38  ;;  %v1754_v38 = vld [vmem:[#allocation13 + $0x1c8] sm:$0xff] }
 0x226   :  { %v1758_v39 = vld [vmem:[#allocation13 + $0x1e8] sm:$0xff] }
 0x227   :  { %v1565_v45 = vmax.f32 %v1564_v42, %v1557_v40  ;;  %v1625_v40 = vld [vmem:[#allocation11 + $0x1c0] sm:$0xff]  ;;  %v3376_v53 = vcombine.low %v1754_v38, %v1758_v39 }
 0x228   :  { %v1629_v42 = vld [vmem:[#allocation11 + $0x1e0] sm:$0xff] }
 0x229   :  { %v4248_v50 = vpack.c.bf16 %v1565_v45, %v1565_v45  ;;  %v3377_v45 = vcombine.high %v1754_v38, %v1758_v39  ;;  %v3439_v47 = vcombine.high %v1625_v40, %v1629_v42  ;;  %v3438_v54 = vcombine.low %v1625_v40, %v1629_v42 }
 0x22b   :  { %2114 = vmatmul.mubr.bf16.vlgmr.msra.gmra.mrb[16].mxu1 %v4248_v50  ;;  %2196 = vmatmul.mubr.bf16.vlgmr.msra.gmra.mrb[16].mxu0 %v4248_v50 }
 0x22c   :  { %2123 = vmatpush1.bf16.msra.mxu1 %v3320_v22  ;;  %2886 = vmatpush1.bf16.msra.mxu0 %v3382_v23  ;;  %v1730_v22 = vld [vmem:[#allocation13 + $0x108] sm:$0xff] }
 0x22d   :  { %2917 = vmatprep.mubr.bf16.mxu0 %v4250_v58  ;;  %2124 = vmatprep.subr.bf16.mxu1 %v3329_v51  ;;  %v1734_v23 = vld [vmem:[#allocation13 + $0x128] sm:$0xff]  ;;  %v1704_v51 = vld [vmem:[#allocation13 + $0x38] sm:$0xff] }
 0x22e   :  { %2887 = vmatprep.subr.bf16.mxu0 %v3391_v13  ;;  %2154 = vmatprep.mubr.bf16.mxu1 %v3964_v15  ;;  %v3353_v62 = vcombine.high %v1730_v22, %v1734_v23  ;;  %v3352_v6 = vcombine.low %v1730_v22, %v1734_v23  ;;  %v1637_v13 = vld [vmem:[#allocation11 + $0x220] sm:$0xff]  ;;  %v3325_v57 = vcombine.high %v1700_v48, %v1704_v51 }
 0x22f   :  { %v3324_v61 = vcombine.low %v1700_v48, %v1704_v51  ;;  %v3446_v30 = vcombine.low %v1633_v52, %v1637_v13  ;;  %v1653_v22 = vld [vmem:[#allocation11 + $0x2a0] sm:$0xff] }
 0x230   :  { %2125 = vmatpush1.bf16.msra.mxu1 %v3328_v55  ;;  %2888 = vmatpush1.bf16.msra.mxu0 %v3390_v56  ;;  %v3447_v55 = vcombine.high %v1633_v52, %v1637_v13  ;;  %v1708_v56 = vld [vmem:[#allocation13 + $0x58] sm:$0xff] }
 0x231   :  { %2126 = vmatprep.subr.bf16.mxu1 %v3337_v59  ;;  %2889 = vmatprep.subr.bf16.mxu0 %v3399_v5  ;;  %v1712_v59 = vld [vmem:[#allocation13 + $0x78] sm:$0xff]  ;;  %v1641_v5 = vld [vmem:[#allocation11 + $0x240] sm:$0xff] }
 0x232   :  { %v3333_v31 = vcombine.high %v1708_v56, %v1712_v59  ;;  %v3332_v23 = vcombine.low %v1708_v56, %v1712_v59  ;;  %v3454_v41 = vcombine.low %v1641_v5, %v1645_v60 }
 0x234   :  { %2127 = vmatpush1.bf16.msra.mxu1 %v3336_v18  ;;  %2890 = vmatpush1.bf16.msra.mxu0 %v3398_v19  ;;  %v3455_v18 = vcombine.high %v1641_v5, %v1645_v60  ;;  %v1716_v19 = vld [vmem:[#allocation13 + $0x98] sm:$0xff] }
 0x235   :  { %2128 = vmatprep.subr.bf16.mxu1 %v3345_v20  ;;  %2891 = vmatprep.subr.bf16.mxu0 %v3407_v21  ;;  %v1720_v20 = vld [vmem:[#allocation13 + $0xb8] sm:$0xff]  ;;  %v1649_v21 = vld [vmem:[#allocation11 + $0x280] sm:$0xff] }
 0x236   :  { %v3341_v34 = vcombine.high %v1716_v19, %v1720_v20  ;;  %v3340_v2 = vcombine.low %v1716_v19, %v1720_v20  ;;  %v3462_v3 = vcombine.low %v1649_v21, %v1653_v22 }
 0x238   :  { %2129 = vmatpush1.bf16.msra.mxu1 %v3344_v35  ;;  %2892 = vmatpush1.bf16.msra.mxu0 %v3406_v46  ;;  %v3463_v35 = vcombine.high %v1649_v21, %v1653_v22  ;;  %v1724_v46 = vld [vmem:[#allocation13 + $0xd8] sm:$0xff] }
 0x239   :  { %2130 = vmatprep.subr.bf16.mxu1 %v3353_v62  ;;  %2893 = vmatprep.subr.bf16.mxu0 %v3415_v63  ;;  %v1728_v62 = vld [vmem:[#allocation13 + $0xf8] sm:$0xff]  ;;  %v1657_v63 = vld [vmem:[#allocation11 + $0x2c0] sm:$0xff] }
 0x23a   :  { %v3349_v4 = vcombine.high %v1724_v46, %v1728_v62  ;;  %v3348_v49 = vcombine.low %v1724_v46, %v1728_v62  ;;  %v3470_v24 = vcombine.low %v1657_v63, %v1661_v0  ;;  %v4266_v62 = vpack.c.bf16 %v4241_v1, %v4241_v1 }
 0x23c   :  { %2131 = vmatpush1.bf16.msra.mxu1 %v3352_v6  ;;  %2894 = vmatpush1.bf16.msra.mxu0 %v3414_v7  ;;  %v3471_v6 = vcombine.high %v1657_v63, %v1661_v0  ;;  %v1732_v7 = vld [vmem:[#allocation13 + $0x118] sm:$0xff] }
 0x23d   :  { %2132 = vmatprep.subr.bf16.mxu1 %v3361_v8  ;;  %2895 = vmatprep.subr.bf16.mxu0 %v3423_v9  ;;  %v1736_v8 = vld [vmem:[#allocation13 + $0x138] sm:$0xff]  ;;  %v1665_v9 = vld [vmem:[#allocation11 + $0x300] sm:$0xff] }
 0x23e   :  { %v3357_v29 = vcombine.high %v1732_v7, %v1736_v8  ;;  %v3356_v38 = vcombine.low %v1732_v7, %v1736_v8  ;;  %v3478_v39 = vcombine.low %v1665_v9, %v1669_v17  ;;  %v1591_v7 = vld [vmem:[#allocation11 + $0xb0] sm:$0xff] }
 0x240   :  { %2133 = vmatpush1.bf16.msra.mxu1 %v3360_v32  ;;  %2896 = vmatpush1.bf16.msra.mxu0 %v3422_v33  ;;  %v1740_v32 = vld [vmem:[#allocation13 + $0x158] sm:$0xff] }
 0x241   :  { %2134 = vmatprep.subr.bf16.mxu1 %v3369_v36  ;;  %2897 = vmatprep.subr.bf16.mxu0 %v3431_v37  ;;  %v1744_v33 = vld [vmem:[#allocation13 + $0x178] sm:$0xff]  ;;  %v1673_v36 = vld [vmem:[#allocation11 + $0x340] sm:$0xff] }
 0x242   :  { %v1677_v37 = vld [vmem:[#allocation11 + $0x360] sm:$0xff]  ;;  %v3365_v40 = vcombine.high %v1740_v32, %v1744_v33  ;;  %v3364_v48 = vcombine.low %v1740_v32, %v1744_v33 }
 0x243   :  { %v3487_v42 = vcombine.high %v1673_v36, %v1677_v37  ;;  %v3486_v51 = vcombine.low %v1673_v36, %v1677_v37  ;;  %v1602_v37 = vld [vmem:[#allocation11 + $0x108] sm:$0xff] }
 0x244   :  { %2135 = vmatpush1.bf16.msra.mxu1 %v3368_v43  ;;  %2898 = vmatpush1.bf16.msra.mxu0 %v3430_v44  ;;  %v1748_v43 = vld [vmem:[#allocation13 + $0x198] sm:$0xff] }
 0x245   :  { %2136 = vmatprep.subr.bf16.mxu1 %v3377_v45  ;;  %2899 = vmatprep.subr.bf16.mxu0 %v3439_v47  ;;  %v1752_v44 = vld [vmem:[#allocation13 + $0x1b8] sm:$0xff]  ;;  %v1681_v45 = vld [vmem:[#allocation11 + $0x380] sm:$0xff] }
 0x246   :  { %v1685_v47 = vld [vmem:[#allocation11 + $0x3a0] sm:$0xff]  ;;  %v3373_v52 = vcombine.high %v1748_v43, %v1752_v44  ;;  %v3372_v56 = vcombine.low %v1748_v43, %v1752_v44 }
 0x247   :  { %v3495_v13 = vcombine.high %v1681_v45, %v1685_v47  ;;  %v3494_v59 = vcombine.low %v1681_v45, %v1685_v47  ;;  %v1610_v47 = vld [vmem:[#allocation11 + $0x148] sm:$0xff] }
 0x248   :  { %2137 = vmatpush1.bf16.msra.mxu1 %v3376_v53  ;;  %2900 = vmatpush1.bf16.msra.mxu0 %v3438_v54  ;;  %v1756_v53 = vld [vmem:[#allocation13 + $0x1d8] sm:$0xff] }
 0x249   :  { %2204 = vmatprep.subr.bf16.mxu1 %v3325_v57  ;;  %2901 = vmatprep.subr.bf16.mxu0 %v3447_v55  ;;  %v1760_v54 = vld [vmem:[#allocation13 + $0x1f8] sm:$0xff]  ;;  %v1689_v57 = vld [vmem:[#allocation11 + $0x3c0] sm:$0xff] }
 0x24a   :  { %v1693_v55 = vld [vmem:[#allocation11 + $0x3e0] sm:$0xff]  ;;  %v3381_v5 = vcombine.high %v1756_v53, %v1760_v54  ;;  %v3380_v19 = vcombine.low %v1756_v53, %v1760_v54 }
 0x24b   :  { %2155 = vmatmul.mubr.bf16.vlgmr.msra.gmra.mrb[20].mxu1 %v4248_v50  ;;  %v3503_v60 = vcombine.high %v1689_v57, %v1693_v55  ;;  %v3502_v20 = vcombine.low %v1689_v57, %v1693_v55  ;;  %v1618_v55 = vld [vmem:[#allocation11 + $0x188] sm:$0xff] }
 0x24c   :  { %2205 = vmatpush1.bf16.msra.mxu1 %v3324_v61  ;;  %2902 = vmatpush1.bf16.msra.mxu0 %v3446_v30  ;;  %v1570_v61 = vld [vmem:[#allocation11 + $0x8] sm:$0xff] }
 0x24d   :  { %2206 = vmatprep.subr.bf16.mxu1 %v3333_v31  ;;  %2903 = vmatprep.subr.bf16.mxu0 %v3455_v18  ;;  %v1574_v30 = vld [vmem:[#allocation11 + $0x28] sm:$0xff]  ;;  %v1571_v31 = vld [vmem:[#allocation11 + $0x10] sm:$0xff] }
 0x24e   :  { %2236 = vmatprep.mubr.bf16.mxu1 %v3964_v15  ;;  %v3479_v15 = vcombine.high %v1665_v9, %v1669_v17  ;;  %v1575_v18 = vld [vmem:[#allocation11 + $0x30] sm:$0xff]  ;;  %v3385_v21 = vcombine.high %v1570_v61, %v1574_v30  ;;  %v3384_v46 = vcombine.low %v1570_v61, %v1574_v30 }
 0x24f   :  { %v3387_v22 = vcombine.high %v1571_v31, %v1575_v18  ;;  %v3386_v63 = vcombine.low %v1571_v31, %v1575_v18  ;;  %v1626_v18 = vld [vmem:[#allocation11 + $0x1c8] sm:$0xff] }
 0x250   :  { %2207 = vmatpush1.bf16.msra.mxu1 %v3332_v23  ;;  %2904 = vmatpush1.bf16.msra.mxu0 %v3454_v41  ;;  %v1578_v23 = vld [vmem:[#allocation11 + $0x48] sm:$0xff] }
 0x251   :  { %2208 = vmatprep.subr.bf16.mxu1 %v3341_v34  ;;  %2905 = vmatprep.subr.bf16.mxu0 %v3463_v35  ;;  %v1582_v41 = vld [vmem:[#allocation11 + $0x68] sm:$0xff]  ;;  %v1579_v34 = vld [vmem:[#allocation11 + $0x50] sm:$0xff] }
 0x252   :  { %v1583_v35 = vld [vmem:[#allocation11 + $0x70] sm:$0xff]  ;;  %v3393_v0 = vcombine.high %v1578_v23, %v1582_v41  ;;  %v3392_v8 = vcombine.low %v1578_v23, %v1582_v41 }
 0x253   :  { %v3394_v1 = vcombine.low %v1579_v34, %v1583_v35 }
 0x254   :  { %2209 = vmatpush1.bf16.msra.mxu1 %v3340_v2  ;;  %2906 = vmatpush1.bf16.msra.mxu0 %v3462_v3  ;;  %v3395_v2 = vcombine.high %v1579_v34, %v1583_v35  ;;  %v1586_v3 = vld [vmem:[#allocation11 + $0x88] sm:$0xff] }
 0x255   :  { %2210 = vmatprep.subr.bf16.mxu1 %v3349_v4  ;;  %2907 = vmatprep.subr.bf16.mxu0 %v3471_v6  ;;  %v1590_v4 = vld [vmem:[#allocation11 + $0xa8] sm:$0xff]  ;;  %v1587_v6 = vld [vmem:[#allocation11 + $0x90] sm:$0xff] }
 0x256   :  { %v3401_v9 = vcombine.high %v1586_v3, %v1590_v4  ;;  %v3403_v17 = vcombine.high %v1587_v6, %v1591_v7  ;;  %v3402_v32 = vcombine.low %v1587_v6, %v1591_v7  ;;  %v1634_v35 = vld [vmem:[#allocation11 + $0x208] sm:$0xff] }
 0x257   :  { %v1642_v7 = vld [vmem:[#allocation11 + $0x248] sm:$0xff] }
 0x258   :  { %2211 = vmatpush1.bf16.msra.mxu1 %v3348_v49  ;;  %2908 = vmatpush1.bf16.msra.mxu0 %v3470_v24  ;;  %v1594_v49 = vld [vmem:[#allocation11 + $0xc8] sm:$0xff] }
 0x259   :  { %2212 = vmatprep.subr.bf16.mxu1 %v3357_v29  ;;  %2909 = vmatprep.subr.bf16.mxu0 %v3479_v15  ;;  %v1598_v24 = vld [vmem:[#allocation11 + $0xe8] sm:$0xff]  ;;  %v1595_v29 = vld [vmem:[#allocation11 + $0xd0] sm:$0xff]  ;;  %v3400_v15 = vcombine.low %v1586_v3, %v1590_v4 }
 0x25a   :  { %v3409_v33 = vcombine.high %v1594_v49, %v1598_v24 }
 0x25c   :  { %2213 = vmatpush1.bf16.msra.mxu1 %v3356_v38  ;;  %2910 = vmatpush1.bf16.msra.mxu0 %v3478_v39  ;;  %v1606_v38 = vld [vmem:[#allocation11 + $0x128] sm:$0xff]  ;;  %v1603_v39 = vld [vmem:[#allocation11 + $0x110] sm:$0xff] }
 0x25d   :  { %2214 = vmatprep.subr.bf16.mxu1 %v3365_v40  ;;  %2911 = vmatprep.subr.bf16.mxu0 %v3487_v42  ;;  %v1607_v40 = vld [vmem:[#allocation11 + $0x130] sm:$0xff]  ;;  %v3408_v42 = vcombine.low %v1594_v49, %v1598_v24  ;;  %v3417_v44 = vcombine.high %v1602_v37, %v1606_v38 }
 0x25e   :  { %v3419_v45 = vcombine.high %v1603_v39, %v1607_v40  ;;  %v3418_v53 = vcombine.low %v1603_v39, %v1607_v40  ;;  %v1658_v40 = vld [vmem:[#allocation11 + $0x2c8] sm:$0xff] }
 0x260   :  { %2215 = vmatpush1.bf16.msra.mxu1 %v3364_v48  ;;  %2912 = vmatpush1.bf16.msra.mxu0 %v3486_v51  ;;  %v1614_v48 = vld [vmem:[#allocation11 + $0x168] sm:$0xff]  ;;  %v1611_v51 = vld [vmem:[#allocation11 + $0x150] sm:$0xff] }
 0x261   :  { %2216 = vmatprep.subr.bf16.mxu1 %v3373_v52  ;;  %2913 = vmatprep.subr.bf16.mxu0 %v3495_v13  ;;  %v1615_v52 = vld [vmem:[#allocation11 + $0x170] sm:$0xff]  ;;  %v3416_v13 = vcombine.low %v1602_v37, %v1606_v38  ;;  %v3425_v54 = vcombine.high %v1610_v47, %v1614_v48 }
 0x262   :  { %v3427_v57 = vcombine.high %v1611_v51, %v1615_v52  ;;  %v3426_v61 = vcombine.low %v1611_v51, %v1615_v52  ;;  %v1666_v52 = vld [vmem:[#allocation11 + $0x308] sm:$0xff] }
 0x264   :  { %2217 = vmatpush1.bf16.msra.mxu1 %v3372_v56  ;;  %2914 = vmatpush1.bf16.msra.mxu0 %v3494_v59  ;;  %v1622_v56 = vld [vmem:[#allocation11 + $0x1a8] sm:$0xff]  ;;  %v1619_v59 = vld [vmem:[#allocation11 + $0x190] sm:$0xff] }
 0x265   :  { %2218 = vmatprep.subr.bf16.mxu1 %v3381_v5  ;;  %2915 = vmatprep.subr.bf16.mxu0 %v3503_v60  ;;  %v1623_v5 = vld [vmem:[#allocation11 + $0x1b0] sm:$0xff]  ;;  %v3424_v60 = vcombine.low %v1610_v47, %v1614_v48  ;;  %v3433_v30 = vcombine.high %v1618_v55, %v1622_v56 }
 0x266   :  { %v3435_v31 = vcombine.high %v1619_v59, %v1623_v5  ;;  %v3434_v23 = vcombine.low %v1619_v59, %v1623_v5  ;;  %v1674_v5 = vld [vmem:[#allocation11 + $0x348] sm:$0xff] }
 0x268   :  { %2219 = vmatpush1.bf16.msra.mxu1 %v3380_v19  ;;  %2916 = vmatpush1.bf16.msra.mxu0 %v3502_v20  ;;  %v1630_v19 = vld [vmem:[#allocation11 + $0x1e8] sm:$0xff]  ;;  %v1627_v20 = vld [vmem:[#allocation11 + $0x1d0] sm:$0xff] }
 0x269   :  { %2926 = vmatprep.subr.bf16.mxu1 %v3385_v21  ;;  %2967 = vmatprep.subr.bf16.mxu0 %v3387_v22  ;;  %v1631_v21 = vld [vmem:[#allocation11 + $0x1f0] sm:$0xff]  ;;  %v3432_v22 = vcombine.low %v1618_v55, %v1622_v56  ;;  %v3441_v41 = vcombine.high %v1626_v18, %v1630_v19 }
 0x26a   :  { %v3443_v34 = vcombine.high %v1627_v20, %v1631_v21  ;;  %v3442_v3 = vcombine.low %v1627_v20, %v1631_v21  ;;  %v1682_v21 = vld [vmem:[#allocation11 + $0x388] sm:$0xff] }
 0x26b   :  { %2237 = vmatmul.mubr.bf16.vlgmr.msra.gmra.mrb[24].mxu1 %v4248_v50  ;;  %2918 = vmatmul.mubr.bf16.vlgmr.msra.gmra.mrb[20].mxu0 %v4266_v62  ;;  %v1599_v50 = vld [vmem:[#allocation11 + $0xf0] sm:$0xff] }
 0x26c   :  { %2927 = vmatpush1.bf16.msra.mxu1 %v3384_v46  ;;  %2958 = vmatprep.mubr.bf16.mxu1 %v4250_v58  ;;  %v3411_v36 = vcombine.high %v1595_v29, %v1599_v50  ;;  %v3410_v43 = vcombine.low %v1595_v29, %v1599_v50  ;;  %v1638_v46 = vld [vmem:[#allocation11 + $0x228] sm:$0xff] }
 0x26d   :  { %2968 = vmatpush1.bf16.msra.mxu0 %v3386_v63  ;;  %2999 = vmatprep.mubr.bf16.mxu0 %v4250_v58  ;;  %v1635_v63 = vld [vmem:[#allocation11 + $0x210] sm:$0xff]  ;;  %v3449_v4 = vcombine.high %v1634_v35, %v1638_v46  ;;  %v1650_v50 = vld [vmem:[#allocation11 + $0x288] sm:$0xff] }
 0x26e   :  { %2928 = vmatprep.subr.bf16.mxu1 %v3393_v0  ;;  %2969 = vmatprep.subr.bf16.mxu0 %v3395_v2  ;;  %v1639_v0 = vld [vmem:[#allocation11 + $0x230] sm:$0xff]  ;;  %v3440_v2 = vcombine.low %v1626_v18, %v1630_v19 }
 0x26f   :  { %v3451_v6 = vcombine.high %v1635_v63, %v1639_v0  ;;  %v3450_v49 = vcombine.low %v1635_v63, %v1639_v0  ;;  %v1690_v0 = vld [vmem:[#allocation11 + $0x3c8] sm:$0xff] }
 0x270   :  { %2929 = vmatpush1.bf16.msra.mxu1 %v3392_v8  ;;  %v1646_v8 = vld [vmem:[#allocation11 + $0x268] sm:$0xff] }
 0x271   :  { %2970 = vmatpush1.bf16.msra.mxu0 %v3394_v1  ;;  %2930 = vmatprep.subr.bf16.mxu1 %v3401_v9  ;;  %v1643_v1 = vld [vmem:[#allocation11 + $0x250] sm:$0xff]  ;;  %v3457_v24 = vcombine.high %v1642_v7, %v1646_v8 }
 0x272   :  { %2971 = vmatprep.subr.bf16.mxu0 %v3403_v17  ;;  %v1647_v9 = vld [vmem:[#allocation11 + $0x270] sm:$0xff]  ;;  %v3448_v17 = vcombine.low %v1634_v35, %v1638_v46 }
 0x273   :  { %v3459_v29 = vcombine.high %v1643_v1, %v1647_v9  ;;  %v3458_v37 = vcombine.low %v1643_v1, %v1647_v9  ;;  %v1572_v9 = vld [vmem:[#allocation11 + $0x18] sm:$0xff] }
 0x274   :  { %2931 = vmatpush1.bf16.msra.mxu1 %v3400_v15  ;;  %v1654_v15 = vld [vmem:[#allocation11 + $0x2a8] sm:$0xff] }
 0x275   :  { %2972 = vmatpush1.bf16.msra.mxu0 %v3402_v32  ;;  %2932 = vmatprep.subr.bf16.mxu1 %v3409_v33  ;;  %v1651_v32 = vld [vmem:[#allocation11 + $0x290] sm:$0xff]  ;;  %v3465_v38 = vcombine.high %v1650_v50, %v1654_v15 }
 0x276   :  { %2973 = vmatprep.subr.bf16.mxu0 %v3411_v36  ;;  %v1655_v33 = vld [vmem:[#allocation11 + $0x2b0] sm:$0xff]  ;;  %v3456_v36 = vcombine.low %v1642_v7, %v1646_v8 }
 0x277   :  { %v3467_v39 = vcombine.high %v1651_v32, %v1655_v33  ;;  %v3466_v47 = vcombine.low %v1651_v32, %v1655_v33 }
 0x278   :  { %2933 = vmatpush1.bf16.msra.mxu1 %v3408_v42  ;;  %v1662_v42 = vld [vmem:[#allocation11 + $0x2e8] sm:$0xff] }
 0x279   :  { %2974 = vmatpush1.bf16.msra.mxu0 %v3410_v43  ;;  %2934 = vmatprep.subr.bf16.mxu1 %v3417_v44  ;;  %v1659_v43 = vld [vmem:[#allocation11 + $0x2d0] sm:$0xff]  ;;  %v3473_v48 = vcombine.high %v1658_v40, %v1662_v42 }
 0x27a   :  { %2975 = vmatprep.subr.bf16.mxu0 %v3419_v45  ;;  %v1663_v44 = vld [vmem:[#allocation11 + $0x2f0] sm:$0xff]  ;;  %v3464_v45 = vcombine.low %v1650_v50, %v1654_v15  ;;  %v1580_v50 = vld [vmem:[#allocation11 + $0x58] sm:$0xff] }
 0x27b   :  { %v3475_v51 = vcombine.high %v1659_v43, %v1663_v44  ;;  %v3474_v55 = vcombine.low %v1659_v43, %v1663_v44  ;;  %v1584_v15 = vld [vmem:[#allocation11 + $0x78] sm:$0xff] }
 0x27c   :  { %2935 = vmatpush1.bf16.msra.mxu1 %v3416_v13  ;;  %v1670_v13 = vld [vmem:[#allocation11 + $0x328] sm:$0xff]  ;;  %v3397_v33 = vcombine.high %v1580_v50, %v1584_v15 }
 0x27d   :  { %2976 = vmatpush1.bf16.msra.mxu0 %v3418_v53  ;;  %2936 = vmatprep.subr.bf16.mxu1 %v3425_v54  ;;  %v1667_v53 = vld [vmem:[#allocation11 + $0x310] sm:$0xff]  ;;  %v3481_v56 = vcombine.high %v1666_v52, %v1670_v13 }
 0x27e   :  { %2977 = vmatprep.subr.bf16.mxu0 %v3427_v57  ;;  %v1671_v54 = vld [vmem:[#allocation11 + $0x330] sm:$0xff]  ;;  %v3472_v57 = vcombine.low %v1658_v40, %v1662_v42  ;;  %v1596_v40 = vld [vmem:[#allocation11 + $0xd8] sm:$0xff] }
 0x27f   :  { %v3483_v59 = vcombine.high %v1667_v53, %v1671_v54  ;;  %v3482_v18 = vcombine.low %v1667_v53, %v1671_v54  ;;  %v1600_v42 = vld [vmem:[#allocation11 + $0xf8] sm:$0xff] }
 0x280   :  { %2937 = vmatpush1.bf16.msra.mxu1 %v3424_v60  ;;  %v1678_v60 = vld [vmem:[#allocation11 + $0x368] sm:$0xff]  ;;  %v3413_v44 = vcombine.high %v1596_v40, %v1600_v42  ;;  %v1620_v54 = vld [vmem:[#allocation11 + $0x198] sm:$0xff] }
 0x281   :  { %2978 = vmatpush1.bf16.msra.mxu0 %v3426_v61  ;;  %2938 = vmatprep.subr.bf16.mxu1 %v3433_v30  ;;  %v1675_v61 = vld [vmem:[#allocation11 + $0x350] sm:$0xff]  ;;  %v3489_v19 = vcombine.high %v1674_v5, %v1678_v60 }
 0x282   :  { %2979 = vmatprep.subr.bf16.mxu0 %v3435_v31  ;;  %v1679_v30 = vld [vmem:[#allocation11 + $0x370] sm:$0xff]  ;;  %v3480_v31 = vcombine.low %v1666_v52, %v1670_v13  ;;  %v1612_v52 = vld [vmem:[#allocation11 + $0x158] sm:$0xff] }
 0x283   :  { %v3491_v20 = vcombine.high %v1675_v61, %v1679_v30  ;;  %v3490_v35 = vcombine.low %v1675_v61, %v1679_v30  ;;  %v1616_v13 = vld [vmem:[#allocation11 + $0x178] sm:$0xff] }
 0x284   :  { %2939 = vmatpush1.bf16.msra.mxu1 %v3432_v22  ;;  %v1686_v22 = vld [vmem:[#allocation11 + $0x3a8] sm:$0xff]  ;;  %v1636_v30 = vld [vmem:[#allocation11 + $0x218] sm:$0xff] }
 0x285   :  { %2980 = vmatpush1.bf16.msra.mxu0 %v3434_v23  ;;  %2940 = vmatprep.subr.bf16.mxu1 %v3441_v41  ;;  %v1683_v23 = vld [vmem:[#allocation11 + $0x390] sm:$0xff]  ;;  %v3497_v46 = vcombine.high %v1682_v21, %v1686_v22 }
 0x286   :  { %2981 = vmatprep.subr.bf16.mxu0 %v3443_v34  ;;  %v1687_v41 = vld [vmem:[#allocation11 + $0x3b0] sm:$0xff]  ;;  %v3488_v34 = vcombine.low %v1674_v5, %v1678_v60  ;;  %v1632_v5 = vld [vmem:[#allocation11 + $0x1f8] sm:$0xff] }
 0x287   :  { %v3499_v63 = vcombine.high %v1683_v23, %v1687_v41  ;;  %v3498_v7 = vcombine.low %v1683_v23, %v1687_v41  ;;  %v1652_v41 = vld [vmem:[#allocation11 + $0x298] sm:$0xff] }
 0x288   :  { %2941 = vmatpush1.bf16.msra.mxu1 %v3440_v2  ;;  %v1694_v2 = vld [vmem:[#allocation11 + $0x3e8] sm:$0xff] }
 0x289   :  { %2982 = vmatpush1.bf16.msra.mxu0 %v3442_v3  ;;  %2942 = vmatprep.subr.bf16.mxu1 %v3449_v4  ;;  %v1691_v3 = vld [vmem:[#allocation11 + $0x3d0] sm:$0xff]  ;;  %v3505_v8 = vcombine.high %v1690_v0, %v1694_v2 }
 0x28a   :  { %2983 = vmatprep.subr.bf16.mxu0 %v3451_v6  ;;  %v1695_v4 = vld [vmem:[#allocation11 + $0x3f0] sm:$0xff]  ;;  %v3496_v6 = vcombine.low %v1682_v21, %v1686_v22  ;;  %v1648_v21 = vld [vmem:[#allocation11 + $0x278] sm:$0xff] }
 0x28b   :  { %v3507_v1 = vcombine.high %v1691_v3, %v1695_v4 }
 0x28c   :  { %2943 = vmatpush1.bf16.msra.mxu1 %v3448_v17  ;;  %v1576_v17 = vld [vmem:[#allocation11 + $0x38] sm:$0xff] }
 0x28d   :  { %2984 = vmatpush1.bf16.msra.mxu0 %v3450_v49  ;;  %2944 = vmatprep.subr.bf16.mxu1 %v3457_v24  ;;  %v3504_v49 = vcombine.low %v1690_v0, %v1694_v2  ;;  %v3506_v24 = vcombine.low %v1691_v3, %v1695_v4  ;;  %v3388_v32 = vcombine.low %v1572_v9, %v1576_v17  ;;  %v1664_v0 = vld [vmem:[#allocation11 + $0x2f8] sm:$0xff] }
 0x28e   :  { %2985 = vmatprep.subr.bf16.mxu0 %v3459_v29  ;;  %v3389_v29 = vcombine.high %v1572_v9, %v1576_v17  ;;  %v1668_v4 = vld [vmem:[#allocation11 + $0x318] sm:$0xff] }
 0x28f   :  { %v1680_v9 = vld [vmem:[#allocation11 + $0x378] sm:$0xff] }
 0x290   :  { %2945 = vmatpush1.bf16.msra.mxu1 %v3456_v36  ;;  %v1588_v36 = vld [vmem:[#allocation11 + $0x98] sm:$0xff] }
 0x291   :  { %2986 = vmatpush1.bf16.msra.mxu0 %v3458_v37  ;;  %2946 = vmatprep.subr.bf16.mxu1 %v3465_v38  ;;  %v1592_v37 = vld [vmem:[#allocation11 + $0xb8] sm:$0xff]  ;;  %v3396_v38 = vcombine.low %v1580_v50, %v1584_v15 }
 0x292   :  { %2987 = vmatprep.subr.bf16.mxu0 %v3467_v39  ;;  %v3405_v39 = vcombine.high %v1588_v36, %v1592_v37  ;;  %v3404_v43 = vcombine.low %v1588_v36, %v1592_v37 }
 0x294   :  { %2947 = vmatpush1.bf16.msra.mxu1 %v3464_v45  ;;  %v1604_v45 = vld [vmem:[#allocation11 + $0x118] sm:$0xff] }
 0x295   :  { %2988 = vmatpush1.bf16.msra.mxu0 %v3466_v47  ;;  %2948 = vmatprep.subr.bf16.mxu1 %v3473_v48  ;;  %v1608_v47 = vld [vmem:[#allocation11 + $0x138] sm:$0xff]  ;;  %v3412_v48 = vcombine.low %v1596_v40, %v1600_v42 }
 0x296   :  { %2989 = vmatprep.subr.bf16.mxu0 %v3475_v51  ;;  %v3421_v51 = vcombine.high %v1604_v45, %v1608_v47  ;;  %v3420_v53 = vcombine.low %v1604_v45, %v1608_v47 }
 0x298   :  { %2949 = vmatpush1.bf16.msra.mxu1 %v3472_v57  ;;  %v1624_v57 = vld [vmem:[#allocation11 + $0x1b8] sm:$0xff] }
 0x299   :  { %2990 = vmatpush1.bf16.msra.mxu0 %v3474_v55  ;;  %2950 = vmatprep.subr.bf16.mxu1 %v3481_v56  ;;  %v3428_v55 = vcombine.low %v1612_v52, %v1616_v13  ;;  %v3437_v56 = vcombine.high %v1620_v54, %v1624_v57  ;;  %v3436_v60 = vcombine.low %v1620_v54, %v1624_v57 }
 0x29a   :  { %2991 = vmatprep.subr.bf16.mxu0 %v3483_v59  ;;  %v1628_v59 = vld [vmem:[#allocation11 + $0x1d8] sm:$0xff] }
 0x29b   :  { %v3445_v61 = vcombine.high %v1628_v59, %v1632_v5 }
 0x29c   :  { %2951 = vmatpush1.bf16.msra.mxu1 %v3480_v31  ;;  %v1640_v31 = vld [vmem:[#allocation11 + $0x238] sm:$0xff] }
 0x29d   :  { %2992 = vmatpush1.bf16.msra.mxu0 %v3482_v18  ;;  %2952 = vmatprep.subr.bf16.mxu1 %v3489_v19  ;;  %v3444_v18 = vcombine.low %v1628_v59, %v1632_v5  ;;  %v3453_v19 = vcombine.high %v1636_v30, %v1640_v31  ;;  %v3452_v22 = vcombine.low %v1636_v30, %v1640_v31  ;;  %v3049_v30 = vld [vmem:[%s4306_s8] sm:$0xff] }
 0x29e   :  { %2993 = vmatprep.subr.bf16.mxu0 %v3491_v20  ;;  %v1644_v20 = vld [vmem:[#allocation11 + $0x258] sm:$0xff]  ;;  %v3054_v31 = vrot.slane %v3049_v30, %v4161_v11 }
 0x29f   :  { %v3461_v23 = vcombine.high %v1644_v20, %v1648_v21 }
 0x2a0   :  { %2953 = vmatpush1.bf16.msra.mxu1 %v3488_v34  ;;  %v1656_v34 = vld [vmem:[#allocation11 + $0x2b8] sm:$0xff] }
 0x2a1   :  { %2994 = vmatpush1.bf16.msra.mxu0 %v3490_v35  ;;  %2954 = vmatprep.subr.bf16.mxu1 %v3497_v46  ;;  %v3460_v35 = vcombine.low %v1644_v20, %v1648_v21  ;;  %v3469_v46 = vcombine.high %v1652_v41, %v1656_v34  ;;  %v3468_v2 = vcombine.low %v1652_v41, %v1656_v34 }
 0x2a2   :  { %2995 = vmatprep.subr.bf16.mxu0 %v3499_v63  ;;  %v1660_v63 = vld [vmem:[#allocation11 + $0x2d8] sm:$0xff]  ;;  %v3066_v21 = vrot.slane %v3049_v30, %v4175_v16  ;;  %v3070_v41 = vrot.slane %v3049_v30, %v4214_v25 }
 0x2a3   :  { %v3477_v3 = vcombine.high %v1660_v63, %v1664_v0 }
 0x2a4   :  { %2955 = vmatpush1.bf16.msra.mxu1 %v3496_v6  ;;  %v1672_v6 = vld [vmem:[#allocation11 + $0x338] sm:$0xff] }
 0x2a5   :  { %2996 = vmatpush1.bf16.msra.mxu0 %v3498_v7  ;;  %2956 = vmatprep.subr.bf16.mxu1 %v3505_v8  ;;  %v3476_v7 = vcombine.low %v1660_v63, %v1664_v0  ;;  %v3485_v8 = vcombine.high %v1668_v4, %v1672_v6  ;;  %v3484_v17 = vcombine.low %v1668_v4, %v1672_v6 }
 0x2a6   :  { %2997 = vmatprep.subr.bf16.mxu0 %v3507_v1  ;;  %v1676_v1 = vld [vmem:[#allocation11 + $0x358] sm:$0xff]  ;;  %v3074_v0 = vrot.slane %v3049_v30, %v318_v27  ;;  %v3082_v27 = vrot.slane %v3049_v30, %v326_v28 }
 0x2a7   :  { %v3492_v50 = vcombine.low %v1676_v1, %v1680_v9 }
 0x2a8   :  { %2957 = vmatpush1.bf16.msra.mxu1 %v3504_v49  ;;  %v3493_v49 = vcombine.high %v1676_v1, %v1680_v9 }
 0x2a9   :  { %2998 = vmatpush1.bf16.msra.mxu0 %v3506_v24  ;;  %3008 = vmatprep.subr.bf16.mxu1 %v3389_v29  ;;  %v1684_v24 = vld [vmem:[#allocation11 + $0x398] sm:$0xff] }
 0x2aa   :  { %v1688_v29 = vld [vmem:[#allocation11 + $0x3b8] sm:$0xff] }
 0x2ab   :  { %2959 = vmatmul.mubr.bf16.vlgmr.msra.gmra.mrb[28].mxu1 %v4266_v62  ;;  %v3501_v15 = vcombine.high %v1684_v24, %v1688_v29  ;;  %v3500_v36 = vcombine.low %v1684_v24, %v1688_v29 }
 0x2ac   :  { %3000 = vmatmul.mubr.bf16.vlgmr.msra.gmra.mrb[24].mxu0 %v4266_v62  ;;  %3009 = vmatpush1.bf16.msra.mxu1 %v3388_v32  ;;  %v1692_v32 = vld [vmem:[#allocation11 + $0x3d8] sm:$0xff] }
 0x2ad   :  { %3040 = vmatprep.mubr.bf16.mxu1 %v4250_v58  ;;  %3010 = vmatprep.subr.bf16.mxu1 %v3397_v33  ;;  %v3429_v58 = vcombine.high %v1612_v52, %v1616_v13  ;;  %v1696_v33 = vld [vmem:[#allocation11 + $0x3f8] sm:$0xff] }
 0x2ae   :  { %v3509_v37 = vcombine.high %v1692_v32, %v1696_v33 }
 0x2b0   :  { %3011 = vmatpush1.bf16.msra.mxu1 %v3396_v38  ;;  %v3508_v38 = vcombine.low %v1692_v32, %v1696_v33  ;;  %v3105_v32 = vld [vmem:[%s4307_s9] sm:$0x3] }
 0x2b1   :  { %3012 = vmatprep.subr.bf16.mxu1 %v3405_v39 }
 0x2b4   :  { %3013 = vmatpush1.bf16.msra.mxu1 %v3404_v43 }
 0x2b5   :  { %3014 = vmatprep.subr.bf16.mxu1 %v3413_v44 }
 0x2b8   :  { %3015 = vmatpush1.bf16.msra.mxu1 %v3412_v48 }
 0x2b9   :  { %3016 = vmatprep.subr.bf16.mxu1 %v3421_v51 }
 0x2bc   :  { %3017 = vmatpush1.bf16.msra.mxu1 %v3420_v53 }
 0x2bd   :  { %3018 = vmatprep.subr.bf16.mxu1 %v3429_v58 }
 0x2c0   :  { %3019 = vmatpush1.bf16.msra.mxu1 %v3428_v55 }
 0x2c1   :  { %3020 = vmatprep.subr.bf16.mxu1 %v3437_v56 }
 0x2c4   :  { %3021 = vmatpush1.bf16.msra.mxu1 %v3436_v60 }
 0x2c5   :  { %3022 = vmatprep.subr.bf16.mxu1 %v3445_v61 }
 0x2c8   :  { %3023 = vmatpush1.bf16.msra.mxu1 %v3444_v18  ;;  %v3062_v18 = vrot.slane %v3049_v30, %v4164_v12 }
 0x2c9   :  { %3024 = vmatprep.subr.bf16.mxu1 %v3453_v19  ;;  %v3058_v19 = vrot.slane %v3049_v30, %v4172_v14 }
 0x2cc   :  { %3025 = vmatpush1.bf16.msra.mxu1 %v3452_v22 }
 0x2cd   :  { %3026 = vmatprep.subr.bf16.mxu1 %v3461_v23 }
 0x2d0   :  { %3027 = vmatpush1.bf16.msra.mxu1 %v3460_v35 }
 0x2d1   :  { %3028 = vmatprep.subr.bf16.mxu1 %v3469_v46 }
 0x2d4   :  { %3029 = vmatpush1.bf16.msra.mxu1 %v3468_v2 }
 0x2d5   :  { %3030 = vmatprep.subr.bf16.mxu1 %v3477_v3 }
 0x2d8   :  { %3031 = vmatpush1.bf16.msra.mxu1 %v3476_v7 }
 0x2d9   :  { %3032 = vmatprep.subr.bf16.mxu1 %v3485_v8 }
 0x2dc   :  { %3033 = vmatpush1.bf16.msra.mxu1 %v3484_v17 }
 0x2dd   :  { %3034 = vmatprep.subr.bf16.mxu1 %v3493_v49 }
 0x2e0   :  { %3035 = vmatpush1.bf16.msra.mxu1 %v3492_v50  ;;  %v3078_v50 = vrot.slane %v3049_v30, %v322_v26 }
 0x2e1   :  { %3036 = vmatprep.subr.bf16.mxu1 %v3501_v15 }
 0x2e4   :  { %3037 = vmatpush1.bf16.msra.mxu1 %v3500_v36 }
 0x2e5   :  { %3038 = vmatprep.subr.bf16.mxu1 %v3509_v37 }
 0x2e8   :  { %3039 = vmatpush1.bf16.msra.mxu1 %v3508_v38 }
 0x2eb   :  { %3041 = vmatmul.mubr.bf16.vlgmr.msra.gmra.mrb[32].mxu1 %v4266_v62 }
 0x2fe   :  { %v2115_v39 = vpop.f32.mrb[16].mxu1  ;;  %v2197_v40 = vpop.f32.mrb[16].mxu0 }
 0x2ff   :  { %v2117_v42 = vpop.f32.mrb[17].mxu1  ;;  %v2199_v43 = vpop.f32.mrb[17].mxu0 }
 0x300   :  { %v2119_v44 = vpop.f32.mrb[18].mxu1  ;;  %v2201_v45 = vpop.f32.mrb[18].mxu0 }
 0x301   :  { %v2120_v47 = vpop.f32.mrb[19].mxu1  ;;  %v2202_v48 = vpop.f32.mrb[19].mxu0  ;;  %v3114_v44 = vrot.slane %v3105_v32, %v4172_v14 }
 0x302   :  { %v3510_v48 = vld [vmem:[#allocation2] ss:$0 sm:$0xff] }
 0x31e   :  { %v2156_v51 = vpop.f32.mrb[20].mxu1 }
 0x31f   :  { %v2158_v52 = vpop.f32.mrb[21].mxu1 }
 0x320   :  { %v2160_v13 = vpop.f32.mrb[22].mxu1 }
 0x321   :  { %v2161_v53 = vpop.f32.mrb[23].mxu1 }
 0x33e   :  { %v2238_v58 = vpop.f32.mrb[24].mxu1  ;;  %v2919_v54 = vpop.f32.mrb[20].mxu0 }
 0x33f   :  { %v2920_v57 = vadd.f32 %v2919_v54, %v2115_v39  ;;  %v2240_v55 = vpop.f32.mrb[25].mxu1  ;;  %v2921_v56 = vpop.f32.mrb[21].mxu0 }
 0x340   :  { %v2922_v59 = vadd.f32 %v2921_v56, %v2117_v42  ;;  %v2242_v5 = vpop.f32.mrb[26].mxu1  ;;  %v2923_v62 = vpop.f32.mrb[22].mxu0  ;;  %v3110_v42 = vrot.slane %v3105_v32, %v4161_v11 }
 0x341   :  { %v2243_v60 = vpop.f32.mrb[27].mxu1  ;;  %v2924_v61 = vpop.f32.mrb[23].mxu0  ;;  %v3091_v3 = vadd.f32 %v3054_v31, %v2920_v57 }
 0x342   :  { %v3092_v8 = vadd.f32 %v3058_v19, %v2922_v59 }
 0x37e   :  { %v2960_v20 = vpop.f32.mrb[28].mxu1 }
 0x37f   :  { %v2961_v22 = vadd.f32 %v2960_v20, %v2156_v51  ;;  %v3001_v23 = vpop.f32.mrb[24].mxu0  ;;  %v2962_v34 = vpop.f32.mrb[29].mxu1 }
 0x380   :  { %v3002_v35 = vadd.f32 %v3001_v23, %v2197_v40  ;;  %v2963_v46 = vadd.f32 %v2962_v34, %v2158_v52  ;;  %v3003_v63 = vpop.f32.mrb[25].mxu0  ;;  %v2964_v2 = vpop.f32.mrb[30].mxu1 }
 0x381   :  { %v3093_v4 = vadd.f32 %v3062_v18, %v2961_v22  ;;  %v3004_v12 = vadd.f32 %v3003_v63, %v2199_v43  ;;  %v3005_v6 = vpop.f32.mrb[26].mxu0  ;;  %v2965_v7 = vpop.f32.mrb[31].mxu1 }
 0x382   :  { %v3094_v1 = vadd.f32 %v3066_v21, %v2963_v46  ;;  %v3006_v16 = vpop.f32.mrb[27].mxu0  ;;  %v3095_v17 = vadd.f32 %v3070_v41, %v3002_v35 }
 0x383   :  { %v3099_v9 = vmax.f32 %v3091_v3, %v3093_v4  ;;  %v3096_v25 = vadd.f32 %v3074_v0, %v3004_v12 }
 0x384   :  { %v3100_v49 = vmax.f32 %v3092_v8, %v3094_v1 }
 0x385   :  { %v3101_v24 = vmax.f32 %v3099_v9, %v3095_v17 }
 0x386   :  { %v3102_v29 = vmax.f32 %v3100_v49, %v3096_v25 }
 0x3be   :  { %v3042_v15 = vpop.f32.mrb[32].mxu1 }
 0x3bf   :  { %v3043_v33 = vadd.f32 %v3042_v15, %v2238_v58  ;;  %v3044_v36 = vpop.f32.mrb[33].mxu1 }
 0x3c0   :  { %v3045_v37 = vadd.f32 %v3044_v36, %v2240_v55  ;;  %v3046_v38 = vpop.f32.mrb[34].mxu1 }
 0x3c1   :  { %v3097_v39 = vadd.f32 %v3078_v50, %v3043_v33  ;;  %v3047_v40 = vpop.f32.mrb[35].mxu1 }
 0x3c2   :  { %v3098_v43 = vadd.f32 %v3082_v27, %v3045_v37 }
 0x3c3   :  { %v3103_v26 = vmax.f32 %v3101_v24, %v3097_v39 }
 0x3c4   :  { %v3104_v45 = vmax.f32 %v3102_v29, %v3098_v43 }
 0x3c5   :  { %v3117_v47 = vmul.f32 %v3110_v42, %v3103_v26 }
 0x3c6   :  { %v3118_v10 = vmul.f32 %v3114_v44, %v3104_v45 }
 0x3c8   :  { %v3119_v28 = vadd.f32 %v3118_v10, %v3117_v47 }
 0x3ca   :  { %3120 = vadd.xlane.f32.xlu0 %v3119_v28 }
 0x457   :  { %v3121_v51 = vpop.xlane.xlu0 %3120 }
 0x458   :  { %v3129_v52 = vadd.f32 %v3510_v48, %v3121_v51 }
 0x45a   :  { %v3511_v13 = vmul.f32 -1.442695, %v3129_v52 }
 0x45c   :  { %3785 = vpow2.f32 %v3511_v13 }
 0x466   :  { %v3786_v53 = vpop.eup %3785 }
 0x467   :  { %v3133_v58 = vadd.f32 1.0, %v3786_v53 }
 0x469   :  { %3787 = vrcp.f32 %v3133_v58 }
 0x473   :  { %v3788_v54 = vpop.eup %3787 }
 0x474   :  { %3137 = vst.msk [vmem:[%s4309_s11] sm:$0xff] %vm3136_vm3, %v3788_v54 }
 0x475   :  { %3142 = vsyncpa [#allocation4], 1 }
 0x476   :  { %3143 = vsyncpa [#allocation6], 1 }
 0x477   :  { %3144 = vsyncpa [#allocation9], 1 }
 0x478   :  { %3145 = vsyncpa [#allocation12], 1 }

</bundles_post_ra>
